<compile_context>
chip_gen: v7x
topology: tpu7x:2x2x1
jax: 0.10.0
libtpu: 0.0.40
codegen_flags: <defaults>
</compile_context>

<pallas_src>
import functools
import math

import jax
import jax.numpy as jnp
import numpy as np
from jax import lax
from jax.experimental import pallas as pl
from jax.experimental.pallas import tpu as pltpu

EPS = 1e-5            # torch.nn.LayerNorm default eps
VOCAB = 1000          # nn.Embedding(1000, hidden_dim)
VOCAB_PAD = 1024      # pad to a 256-multiple for the MXU K dimension
_HALF_PI = math.pi / 2.0

_COMPILER_PARAMS = pltpu.CompilerParams(
    # Row tiles are independent -> shard across both TCs on v7x (no-op on v5e/v6e).
    dimension_semantics=("parallel",),
    # Raise scoped VMEM above the 16/32 MiB defaults, stay under v7x's 64 MiB.
    vmem_limit_bytes=48 * 1024 * 1024,
)


# ---------------------------------------------------------------------------
# kernels
# ---------------------------------------------------------------------------
def _layernorm(h, gamma, beta):
    # PyTorch LayerNorm over the last dim: biased variance, eps inside rsqrt.
    # Variance via E[x^2] - mean^2 -> one fewer full [T,H] VPU pass.
    mean = jnp.mean(h, axis=-1, keepdims=True)
    m2 = jnp.mean(h * h, axis=-1, keepdims=True)
    var = jnp.maximum(m2 - mean * mean, 0.0)
    return (h - mean) * lax.rsqrt(var + EPS) * gamma + beta


def node_transform_kernel(x_ref, w_ref, c_ref, o_ref):
    # o = LayerNorm(x @ W + b); c_ref rows = [bias, gamma, beta, 0...].
    c = c_ref[...]
    h = jnp.dot(x_ref[...].astype(jnp.bfloat16), w_ref[...],
                preferred_element_type=jnp.float32)
    h = h + c[0:1]
    o_ref[...] = _layernorm(h, c[1:2], c[2:3]).astype(o_ref.dtype)


def _onehot_embed(idx, tab_ref, k_chunk):
    # sum_a onehot(idx[:, a]) @ folded_table[a], as one long-K MXU matmul over the
    # concatenated (A*VOCAB_PAD) vocab.  One-hot is exact in bf16; f32 accumulation.
    T, A = idx.shape
    if k_chunk is None or k_chunk >= A * VOCAB_PAD:
        iota = lax.broadcasted_iota(jnp.int32, (T, VOCAB_PAD), 1)
        onehot = jnp.concatenate(
            [(iota == idx[:, a:a + 1]).astype(jnp.bfloat16) for a in range(A)],
            axis=1)                                           # [T, A*VOCAB_PAD]
        return jnp.dot(onehot, tab_ref[...], preferred_element_type=jnp.float32)
    # v5e path: single vst slot -> keep the live one-hot small by chunking K.
    assert VOCAB_PAD % k_chunk == 0
    iota = lax.broadcasted_iota(jnp.int32, (T, k_chunk), 1)
    h = None
    for a in range(A):
        for s in range(0, VOCAB_PAD, k_chunk):
            onehot = (iota == (idx[:, a:a + 1] - s)).astype(jnp.bfloat16)
            part = jnp.dot(onehot, tab_ref[pl.ds(a * VOCAB_PAD + s, k_chunk), :],
                           preferred_element_type=jnp.float32)
            h = part if h is None else h + part
    return h


def edge_pos_kernel(idx_ref, pos_ref, tab_ref, c_ref, edge_o_ref, pos_o_ref,
                    *, k_chunk):
    # idx_ref : [T, A] int32 categorical attribute ids (tile of rows)
    # pos_ref : [T, 1] f32 event ordering
    # tab_ref : [A*VOCAB_PAD, H] bf16 — embedding tables with the EdgeTransform
    #           Linear already folded in, flattened over attributes.
    # c_ref   : [8, H] f32 packed constants:
    #           rows = [edge_bias, gamma, beta, pe_div, pe_phase, 0, 0, 0]
    idx = idx_ref[...]
    c = c_ref[...]

    h = _onehot_embed(idx, tab_ref, k_chunk) + c[0:1]
    edge_o_ref[...] = _layernorm(h, c[1:2], c[2:3]).astype(edge_o_ref.dtype)

    # Positional encoding: exactly one EUP transcendental per element
    # (cos(x) == sin(x + pi/2)); frequencies and odd-lane phase precomputed host-side.
    angle = pos_ref[...] * c[3:4] + c[4:5]                   # [T,1]*[1,H]+[1,H] -> [T,H]
    pos_o_ref[...] = jnp.sin(angle).astype(pos_o_ref.dtype)


# ---------------------------------------------------------------------------
# wrappers: grid over rows, weights/tables resident, streamed row tiles
# ---------------------------------------------------------------------------
def _round_up(x, m):
    return ((x + m - 1) // m) * m


def _row_tile(n_rows, target=512, min_steps=1):
    # Pick the largest tile <= target, then shrink (pow2-ish) until the grid has at
    # least `min_steps` steps so both v7x TensorCores get >= 2 pipelined steps.
    tile = min(target, _round_up(n_rows, 8))
    if min_steps > 1:
        while tile > 8 and pl.cdiv(n_rows, tile) < min_steps:
            tile = max(8, _round_up(tile // 2, 8))
    return tile


def node_transform(x, w_bf16, consts, *, row_tile=512):
    # This call is tiny / launch-bound; keep it a single (or few) grid steps.
    N, node_dim = x.shape
    H = w_bf16.shape[1]
    tn = _row_tile(N, row_tile, min_steps=1)
    return pl.pallas_call(
        node_transform_kernel,
        out_shape=jax.ShapeDtypeStruct((N, H), jnp.bfloat16),
        grid=(pl.cdiv(N, tn),),
        in_specs=[
            pl.BlockSpec((tn, node_dim), lambda i: (i, 0)),   # streamed rows
            pl.BlockSpec((node_dim, H), lambda i: (0, 0)),    # resident bf16 weight
            pl.BlockSpec((8, H), lambda i: (0, 0)),           # packed [bias;gamma;beta]
        ],
        out_specs=pl.BlockSpec((tn, H), lambda i: (i, 0)),
        compiler_params=_COMPILER_PARAMS,
    )(x, w_bf16, consts)


def edge_transform_and_pos_enc(attr_idx, pos, folded_flat, consts, *,
                               row_tile=512, min_steps=4, k_chunk=None):
    E, A = attr_idx.shape
    KV, H = folded_flat.shape
    assert KV == A * VOCAB_PAD
    te = _row_tile(E, row_tile, min_steps=min_steps)
    kernel = functools.partial(edge_pos_kernel, k_chunk=k_chunk)
    # NOTE: attr_idx keeps its [E, A] layout (A pads to 128 lanes in VMEM); the waste
    # is negligible next to the one-hot intermediate and keeps construction vectorized.
    edge_h, pos_h = pl.pallas_call(
        kernel,
        out_shape=(jax.ShapeDtypeStruct((E, H), jnp.bfloat16),
                   jax.ShapeDtypeStruct((E, H), jnp.bfloat16)),
        grid=(pl.cdiv(E, te),),
        in_specs=[
            pl.BlockSpec((te, A), lambda i: (i, 0)),          # attr ids (streamed)
            pl.BlockSpec((te, 1), lambda i: (i, 0)),          # positions (streamed)
            pl.BlockSpec((KV, H), lambda i: (0, 0)),          # folded tables (resident)
            pl.BlockSpec((8, H), lambda i: (0, 0)),           # packed constants (resident)
        ],
        out_specs=(pl.BlockSpec((te, H), lambda i: (i, 0)),
                   pl.BlockSpec((te, H), lambda i: (i, 0))),
        compiler_params=_COMPILER_PARAMS,
    )(attr_idx, pos, folded_flat, consts)
    return edge_h, pos_h


# ---------------------------------------------------------------------------
# parameter construction + offline folding / packing
# ---------------------------------------------------------------------------
def init_params(key, node_dim, edge_dim, hidden_dim):
    num_attr = edge_dim - 1
    ks = jax.random.split(key, 5)
    return {
        # NodeTransform = Linear(node_dim, hidden) + LayerNorm(hidden)
        "node_w": jax.random.normal(ks[0], (node_dim, hidden_dim), jnp.float32) * 0.1,
        "node_b": jax.random.normal(ks[1], (1, hidden_dim), jnp.float32) * 0.01,
        "node_gamma": jnp.ones((1, hidden_dim), jnp.float32),
        "node_beta": jnp.zeros((1, hidden_dim), jnp.float32),
        # AttrEmbedder = num_attr x Embedding(1000, hidden)
        "tables": jax.random.normal(ks[2], (num_attr, VOCAB, hidden_dim), jnp.float32) * 0.1,
        # EdgeTransform = Linear(hidden*num_attr, hidden) + LayerNorm(hidden)
        # NOTE: stored as [in, out]; when importing real PyTorch nn.Linear weights
        # ([out, in], x @ W.T) transpose + keep the attribute block order.
        "edge_w": jax.random.normal(ks[3], (hidden_dim * num_attr, hidden_dim), jnp.float32) * 0.1,
        "edge_b": jax.random.normal(ks[4], (1, hidden_dim), jnp.float32) * 0.01,
        "edge_gamma": jnp.ones((1, hidden_dim), jnp.float32),
        "edge_beta": jnp.zeros((1, hidden_dim), jnp.float32),
    }


def make_pe_consts(hidden_dim):
    i = jnp.arange(hidden_dim, dtype=jnp.float32)
    half = jnp.floor(i / 2.0)
    div = jnp.exp(-(2.0 * half) * (math.log(10000.0) / hidden_dim))      # [H]
    phase = jnp.where(jnp.arange(hidden_dim) % 2 == 1, _HALF_PI, 0.0)    # [H]
    return div, phase


def _pack_rows(rows, hidden_dim):
    c = jnp.zeros((8, hidden_dim), jnp.float32)
    for r, v in enumerate(rows):
        c = c.at[r].set(jnp.reshape(v, (-1,)))
    return c


def prepare_kernel_params(params, hidden_dim):
    """Fold the EdgeTransform Linear into the embedding tables (offline, f32),
    pad the vocab to a 256-multiple, flatten over attributes, cast to bf16, and
    pack the small per-kernel constants into single (8, H) resident tiles."""
    tables = params["tables"]                            # [A, VOCAB, H] f32
    A, V, H = tables.shape
    w3 = params["edge_w"].reshape(A, H, H)               # row block a = W[a*H:(a+1)*H]
    folded = jnp.einsum("avh,ahk->avk", tables, w3)      # [A, VOCAB, H]
    folded = jnp.pad(folded, ((0, 0), (0, VOCAB_PAD - V), (0, 0)))
    folded_flat = folded.reshape(A * VOCAB_PAD, H).astype(jnp.bfloat16)

    pe_div, pe_phase = make_pe_consts(hidden_dim)
    edge_consts = _pack_rows(
        [params["edge_b"], params["edge_gamma"], params["edge_beta"], pe_div, pe_phase],
        hidden_dim)
    node_consts = _pack_rows(
        [params["node_b"], params["node_gamma"], params["node_beta"]], hidden_dim)

    return {
        "folded_flat": folded_flat,
        "edge_consts": edge_consts,
        "node_consts": node_consts,
        "node_w_bf16": params["node_w"].astype(jnp.bfloat16),
    }


def first_view_pre_layer(params, kparams, node_feats, edge_attr, *, k_chunk=None):
    """node_feats: [N, node_dim] float; edge_attr: [E, edge_dim] float
    (col 0 = event ordering, cols 1.. = categorical attribute ids < 2^24)."""
    node_h = node_transform(node_feats, kparams["node_w_bf16"], kparams["node_consts"])

    attr_idx = edge_attr[:, 1:].astype(jnp.int32)         # [E, num_attr]
    pos = edge_attr[:, 0:1].astype(jnp.float32)           # [E, 1]
    edge_h, pos_h = edge_transform_and_pos_enc(
        attr_idx, pos, kparams["folded_flat"], kparams["edge_consts"], k_chunk=k_chunk)
    return node_h, edge_h, pos_h


# ---------------------------------------------------------------------------
# pure-JAX reference (unfolded, f32) for correctness
# ---------------------------------------------------------------------------
def reference(params, node_feats, edge_attr, hidden_dim):
    def ln(h, g, b):
        m = h.mean(-1, keepdims=True)
        v = ((h - m) ** 2).mean(-1, keepdims=True)
        return (h - m) / jnp.sqrt(v + EPS) * g + b

    node_h = ln(node_feats @ params["node_w"] + params["node_b"],
                params["node_gamma"], params["node_beta"])

    idx = edge_attr[:, 1:].astype(jnp.int32)
    embs = [params["tables"][a][idx[:, a]] for a in range(idx.shape[1])]
    cat = jnp.concatenate(embs, axis=-1)
    edge_h = ln(cat @ params["edge_w"] + params["edge_b"],
                params["edge_gamma"], params["edge_beta"])

    pos = edge_attr[:, 0:1].astype(jnp.float32)
    i = jnp.arange(hidden_dim)
    div = jnp.exp(-(2.0 * (i // 2).astype(jnp.float32)) * (math.log(10000.0) / hidden_dim))
    angle = pos * div[None, :]
    pos_h = jnp.where(i[None, :] % 2 == 0, jnp.sin(angle), jnp.cos(angle))
    return node_h, edge_h, pos_h


# ---------------------------------------------------------------------------
if __name__ == "__main__":
    node_dim, edge_dim, hidden_dim = 16, 4, 128     # num_attr = edge_dim - 1 = 3
    num_nodes, num_edges = 512, 1024                # edge grid -> 4 row tiles of 256

    key = jax.random.PRNGKey(0)
    k_param, k_node, k_attr = jax.random.split(key, 3)

    params = init_params(k_param, node_dim, edge_dim, hidden_dim)
    kparams = prepare_kernel_params(params, hidden_dim)

    node_feats = jax.random.normal(k_node, (num_nodes, node_dim), jnp.float32)
    event_order = jnp.arange(num_edges, dtype=jnp.float32)[:, None]          # [E, 1]
    attr_ids = jax.random.randint(k_attr, (num_edges, edge_dim - 1), 0, VOCAB
                                  ).astype(jnp.float32)                       # [E, num_attr]
    edge_attr = jnp.concatenate([event_order, attr_ids], axis=1)             # [E, edge_dim]

    node_h, edge_h, pos_h = first_view_pre_layer(params, kparams, node_feats, edge_attr)
    jax.block_until_ready((node_h, edge_h, pos_h))

    assert node_h.shape == (num_nodes, hidden_dim) and node_h.dtype == jnp.bfloat16
    assert edge_h.shape == (num_edges, hidden_dim) and edge_h.dtype == jnp.bfloat16
    assert pos_h.shape == (num_edges, hidden_dim) and pos_h.dtype == jnp.bfloat16

    ref_node, ref_edge, ref_pos = reference(params, node_feats, edge_attr, hidden_dim)
    np.testing.assert_allclose(np.asarray(node_h.astype(jnp.float32)),
                               np.asarray(ref_node), atol=6e-2, rtol=0)   # bf16 mm + bf16 out
    np.testing.assert_allclose(np.asarray(edge_h.astype(jnp.float32)),
                               np.asarray(ref_edge), atol=7e-2, rtol=0)   # bf16 tables + out
    np.testing.assert_allclose(np.asarray(pos_h.astype(jnp.float32)),
                               np.asarray(ref_pos), atol=2e-2, rtol=0)    # bf16 out

    print("KERNEL_OK")
</pallas_src>

<mosaic_0001>
module attributes {stable_mosaic.version = 11 : i64} {
  func.func @node_transform_kernel(%arg0: i32, %arg1: memref<512x16xf32, #tpu.memory_space<vmem>>, %arg2: memref<16x128xbf16, #tpu.memory_space<vmem>>, %arg3: memref<8x128xf32, #tpu.memory_space<vmem>>, %arg4: memref<512x128xbf16, #tpu.memory_space<vmem>>) attributes {dimension_semantics = [#tpu.dimension_semantics<parallel>], iteration_bounds = array<i64: 1>, scalar_prefetch = 0 : i64, scratch_operands = 0 : i64, tpu.core_type = #tpu.core_type<tc>, window_params = [{transform_indices = @transform_0, window_bounds = array<i64: 512, 16>}, {pipeline_mode = #tpu.pipeline_mode<synchronous>, transform_indices = @transform_1, window_bounds = array<i64: 16, 128>}, {pipeline_mode = #tpu.pipeline_mode<synchronous>, transform_indices = @transform_2, window_bounds = array<i64: 8, 128>}, {transform_indices = @transform_3, window_bounds = array<i64: 512, 128>}]} {
    %c0 = arith.constant 0 : index
    %c0_0 = arith.constant 0 : index
    %0 = vector.load %arg3[%c0, %c0_0] : memref<8x128xf32, #tpu.memory_space<vmem>>, vector<8x128xf32>
    %c0_1 = arith.constant 0 : index
    %c0_2 = arith.constant 0 : index
    %1 = vector.load %arg1[%c0_1, %c0_2] : memref<512x16xf32, #tpu.memory_space<vmem>>, vector<512x16xf32>
    %2 = arith.truncf %1 : vector<512x16xf32> to vector<512x16xbf16>
    %c0_3 = arith.constant 0 : index
    %c0_4 = arith.constant 0 : index
    %3 = vector.load %arg2[%c0_3, %c0_4] : memref<16x128xbf16, #tpu.memory_space<vmem>>, vector<16x128xbf16>
    %cst = arith.constant dense<0.000000e+00> : vector<512x128xf32>
    %4 = tpu.matmul %2, %3, %cst {dimension_numbers = #tpu.dot_dimension_numbers<[1], [0], [0], [1], [0, 0, 1, 1], [], []>} : vector<512x16xbf16>, vector<16x128xbf16>, vector<512x128xf32> -> vector<512x128xf32>
    %5 = vector.extract_strided_slice %0 {offsets = [0, 0], sizes = [1, 128], strides = [1, 1]} : vector<8x128xf32> to vector<1x128xf32>
    %6 = vector.broadcast %5 : vector<1x128xf32> to vector<512x128xf32>
    %7 = arith.addf %4, %6 : vector<512x128xf32>
    %8 = vector.extract_strided_slice %0 {offsets = [1, 0], sizes = [1, 128], strides = [1, 1]} : vector<8x128xf32> to vector<1x128xf32>
    %9 = vector.extract_strided_slice %0 {offsets = [2, 0], sizes = [1, 128], strides = [1, 1]} : vector<8x128xf32> to vector<1x128xf32>
    %cst_5 = arith.constant dense<0.000000e+00> : vector<512xf32>
    %10 = vector.multi_reduction <add>, %7, %cst_5 [1] : vector<512x128xf32> to vector<512xf32>
    %11 = vector.shape_cast %10 : vector<512xf32> to vector<512x1xf32>
    %cst_6 = arith.constant 1.280000e+02 : f32
    %12 = vector.broadcast %cst_6 : f32 to vector<512x1xf32>
    %13 = arith.divf %11, %12 : vector<512x1xf32>
    %14 = arith.mulf %7, %7 : vector<512x128xf32>
    %cst_7 = arith.constant dense<0.000000e+00> : vector<512xf32>
    %15 = vector.multi_reduction <add>, %14, %cst_7 [1] : vector<512x128xf32> to vector<512xf32>
    %16 = vector.shape_cast %15 : vector<512xf32> to vector<512x1xf32>
    %cst_8 = arith.constant 1.280000e+02 : f32
    %17 = vector.broadcast %cst_8 : f32 to vector<512x1xf32>
    %18 = arith.divf %16, %17 : vector<512x1xf32>
    %19 = arith.mulf %13, %13 : vector<512x1xf32>
    %20 = arith.subf %18, %19 : vector<512x1xf32>
    %cst_9 = arith.constant 0.000000e+00 : f32
    %21 = vector.broadcast %cst_9 : f32 to vector<512x1xf32>
    %22 = arith.maximumf %20, %21 : vector<512x1xf32>
    %23 = vector.broadcast %13 : vector<512x1xf32> to vector<512x128xf32>
    %24 = arith.subf %7, %23 : vector<512x128xf32>
    %cst_10 = arith.constant 9.99999974E-6 : f32
    %25 = vector.broadcast %cst_10 : f32 to vector<512x1xf32>
    %26 = arith.addf %22, %25 : vector<512x1xf32>
    %27 = math.rsqrt %26 : vector<512x1xf32>
    %28 = vector.broadcast %27 : vector<512x1xf32> to vector<512x128xf32>
    %29 = arith.mulf %24, %28 : vector<512x128xf32>
    %30 = vector.broadcast %8 : vector<1x128xf32> to vector<512x128xf32>
    %31 = arith.mulf %29, %30 : vector<512x128xf32>
    %32 = vector.broadcast %9 : vector<1x128xf32> to vector<512x128xf32>
    %33 = arith.addf %31, %32 : vector<512x128xf32>
    %34 = arith.truncf %33 : vector<512x128xf32> to vector<512x128xbf16>
    %c0_11 = arith.constant 0 : index
    %c0_12 = arith.constant 0 : index
    %35 = vector.load %arg4[%c0_11, %c0_12] : memref<512x128xbf16, #tpu.memory_space<vmem>>, vector<512x128xbf16>
    tpu.vector_store %arg4[%c0_11, %c0_12], %34 {strides = array<i32>} : memref<512x128xbf16, #tpu.memory_space<vmem>>, vector<512x128xbf16>,
    return
  }
  func.func @transform_0(%arg0: i32) -> (i32, i32) {
    %c0_i32 = arith.constant 0 : i32
    %c0_i32_0 = arith.constant 0 : i32
    return %arg0, %c0_i32 : i32, i32
  }
  func.func @transform_1(%arg0: i32) -> (i32, i32) {
    %c0_i32 = arith.constant 0 : i32
    %c0_i32_0 = arith.constant 0 : i32
    %c0_i32_1 = arith.constant 0 : i32
    return %c0_i32, %c0_i32_0 : i32, i32
  }
  func.func @transform_2(%arg0: i32) -> (i32, i32) {
    %c0_i32 = arith.constant 0 : i32
    %c0_i32_0 = arith.constant 0 : i32
    %c0_i32_1 = arith.constant 0 : i32
    return %c0_i32, %c0_i32_0 : i32, i32
  }
  func.func @transform_3(%arg0: i32) -> (i32, i32) {
    %c0_i32 = arith.constant 0 : i32
    %c0_i32_0 = arith.constant 0 : i32
    return %arg0, %c0_i32 : i32, i32
  }
}

</mosaic_0001>

<bundles_post_ra>
// kernel: tpu_custom_call.1
= control target key start
LH: loop header
LB: loop body
LE: loop exit
PB: predicated region body
PF: predicated region fallthrough
CT: control target
= control target key end

     0   :  { %vm125_vm0 = vcmask 130048   ;;  %s3834_s0 = inlined_call_operand.vmem [shape: f32[512,16], index: 0, kind: input, shape index: {}]   ;;  %s3835_s1 = inlined_call_operand.vmem [shape: bf16[16,128], index: 1, kind: input, shape index: {}]   ;;  %s3836_s2 = inlined_call_operand.vmem [shape: f32[8,128], index: 2, kind: input, shape index: {}]   ;;  %s3837_s3 = inlined_call_operand.hbm [shape: bf16[512,128], index: 3, kind: output, shape index: {}]  }
   0x1   :  { %v2336_v0 = vld [vmem:[%s3835_s1] sm:$0xff]   ;;  %v18_v2 = vld [vmem:[%s3834_s0 + $0x8] sm:$0xff]  ;;  %v19_v6 = vld [vmem:[%s3834_s0 + $0x10] sm:$0xff] }
   0x2   :  { %v17_v1 = vld [vmem:[%s3834_s0] sm:$0xff]  ;;  %2265 = vmatprep.subr.bf16.mxu0 %v2336_v0  ;;  %2331 = vmatprep.subr.bf16.mxu1 %v2336_v0  ;;  %v50_v5 = vld [vmem:[%s3834_s0 + $0x108] sm:$0xff]  ;;  %v20_v7 = vld [vmem:[%s3834_s0 + $0x18] sm:$0xff] }
   0x3   :  { %v49_v3 = vld [vmem:[%s3834_s0 + $0x100] sm:$0xff]  ;;  %v81_v4 = vpack.c.bf16 %v18_v2, %v17_v1  ;;  %2266 = vmatpush3.bf16.msra.mxu0 %v2336_v0  ;;  %2332 = vmatpush3.bf16.msra.mxu1 %v2336_v0  ;;  %v82_v9 = vpack.c.bf16 %v20_v7, %v19_v6  ;;  %v51_v10 = vld [vmem:[%s3834_s0 + $0x110] sm:$0xff]  ;;  %v52_v11 = vld [vmem:[%s3834_s0 + $0x118] sm:$0xff] }
   0x4   :  { %v97_v8 = vpack.c.bf16 %v50_v5, %v49_v3  ;;  %v21_v12 = vld [vmem:[%s3834_s0 + $0x20] sm:$0xff]  ;;  %v98_v13 = vpack.c.bf16 %v52_v11, %v51_v10  ;;  %v22_v14 = vld [vmem:[%s3834_s0 + $0x28] sm:$0xff]  ;;  %v23_v18 = vld [vmem:[%s3834_s0 + $0x30] sm:$0xff] }
   0x5   :  { %2267 = vmatprep.mubr.msk.bf16.mxu0 %vm125_vm0, %v81_v4  ;;  %v83_v15 = vpack.c.bf16 %v22_v14, %v21_v12  ;;  %v53_v16 = vld [vmem:[%s3834_s0 + $0x120] sm:$0xff]  ;;  %v54_v17 = vld [vmem:[%s3834_s0 + $0x128] sm:$0xff]  ;;  %v24_v19 = vld [vmem:[%s3834_s0 + $0x38] sm:$0xff] }
   0x6   :  { %2299 = vmatprep.mubr.msk.bf16.mxu1 %vm125_vm0, %v97_v8  ;;  %2268 = vmatmul.mubr.msk.bf16.vlgmr.msra.gmra.mrb[0].mxu0 %vm125_vm0, %v82_v9  ;;  %v99_v20 = vpack.c.bf16 %v54_v17, %v53_v16  ;;  %v55_v21 = vld [vmem:[%s3834_s0 + $0x130] sm:$0xff]  ;;  %v56_v22 = vld [vmem:[%s3834_s0 + $0x138] sm:$0xff]  ;;  %v25_v23 = vld [vmem:[%s3834_s0 + $0x40] sm:$0xff]  ;;  %v84_v27 = vpack.c.bf16 %v24_v19, %v23_v18 }
   0x7   :  { %2300 = vmatmul.mubr.msk.bf16.vlgmr.msra.gmra.mrb[0].mxu1 %vm125_vm0, %v98_v13  ;;  %2271 = vmatprep.mubr.msk.bf16.mxu0 %vm125_vm0, %v83_v15  ;;  %v26_v24 = vld [vmem:[%s3834_s0 + $0x48] sm:$0xff]  ;;  %v57_v25 = vld [vmem:[%s3834_s0 + $0x140] sm:$0xff]  ;;  %v100_v28 = vpack.c.bf16 %v56_v22, %v55_v21  ;;  %v27_v31 = vld [vmem:[%s3834_s0 + $0x50] sm:$0xff] }
   0x8   :  { %2303 = vmatprep.mubr.msk.bf16.mxu1 %vm125_vm0, %v99_v20  ;;  %v58_v26 = vld [vmem:[%s3834_s0 + $0x148] sm:$0xff]  ;;  %v85_v29 = vpack.c.bf16 %v26_v24, %v25_v23  ;;  %v28_v32 = vld [vmem:[%s3834_s0 + $0x58] sm:$0xff]  ;;  %v59_v33 = vld [vmem:[%s3834_s0 + $0x150] sm:$0xff] }
   0x9   :  { %v101_v30 = vpack.c.bf16 %v58_v26, %v57_v25  ;;  %v60_v34 = vld [vmem:[%s3834_s0 + $0x158] sm:$0xff]  ;;  %v29_v35 = vld [vmem:[%s3834_s0 + $0x60] sm:$0xff]  ;;  %v30_v36 = vld [vmem:[%s3834_s0 + $0x68] sm:$0xff]  ;;  %v86_v39 = vpack.c.bf16 %v28_v32, %v27_v31 }
   0xa   :  { %v61_v37 = vld [vmem:[%s3834_s0 + $0x160] sm:$0xff]  ;;  %v62_v38 = vld [vmem:[%s3834_s0 + $0x168] sm:$0xff]  ;;  %v102_v40 = vpack.c.bf16 %v60_v34, %v59_v33  ;;  %v87_v41 = vpack.c.bf16 %v30_v36, %v29_v35 }
   0xb   :  { %v103_v42 = vpack.c.bf16 %v62_v38, %v61_v37 }
   0xe   :  { %2272 = vmatmul.mubr.msk.bf16.gmra.mrb[4].mxu0 %vm125_vm0, %v84_v27 }
   0xf   :  { %2304 = vmatmul.mubr.msk.bf16.gmra.mrb[4].mxu1 %vm125_vm0, %v100_v28  ;;  %2275 = vmatprep.mubr.msk.bf16.mxu0 %vm125_vm0, %v85_v29 }
  0x10   :  { %2307 = vmatprep.mubr.msk.bf16.mxu1 %vm125_vm0, %v101_v30 }
  0x11   :  { %8 = vsyncpa [#allocation3], 0  ;;  %v31_v43 = vld [vmem:[%s3834_s0 + $0x70] sm:$0xff]  ;;  %v32_v44 = vld [vmem:[%s3834_s0 + $0x78] sm:$0xff]  ;;  %v115_v33 = vlaneseq }
  0x12   :  { %v63_v45 = vld [vmem:[%s3834_s0 + $0x170] sm:$0xff]  ;;  %v64_v46 = vld [vmem:[%s3834_s0 + $0x178] sm:$0xff]  ;;  %v33_v47 = vld [vmem:[%s3834_s0 + $0x80] sm:$0xff]  ;;  %v88_v51 = vpack.c.bf16 %v32_v44, %v31_v43 }
  0x13   :  { %v34_v48 = vld [vmem:[%s3834_s0 + $0x88] sm:$0xff]  ;;  %v65_v49 = vld [vmem:[%s3834_s0 + $0x180] sm:$0xff]  ;;  %v104_v52 = vpack.c.bf16 %v64_v46, %v63_v45  ;;  %v35_v55 = vld [vmem:[%s3834_s0 + $0x90] sm:$0xff]  ;;  %v2739_v34 = vshrl.u32 %v115_v33, 7 }
  0x14   :  { %v66_v50 = vld [vmem:[%s3834_s0 + $0x188] sm:$0xff]  ;;  %v89_v53 = vpack.c.bf16 %v34_v48, %v33_v47  ;;  %v36_v56 = vld [vmem:[%s3834_s0 + $0x98] sm:$0xff]  ;;  %v67_v57 = vld [vmem:[%s3834_s0 + $0x190] sm:$0xff] }
  0x15   :  { %v105_v54 = vpack.c.bf16 %v66_v50, %v65_v49  ;;  %v68_v58 = vld [vmem:[%s3834_s0 + $0x198] sm:$0xff]  ;;  %v37_v59 = vld [vmem:[%s3834_s0 + $0xa0] sm:$0xff]  ;;  %v38_v60 = vld [vmem:[%s3834_s0 + $0xa8] sm:$0xff]  ;;  %v90_v63 = vpack.c.bf16 %v36_v56, %v35_v55  ;;  %v117_v35 = vsub.s32 0, %v2739_v34 }
  0x16   :  { %2276 = vmatmul.mubr.msk.bf16.gmra.mrb[8].mxu0 %vm125_vm0, %v86_v39  ;;  %v69_v61 = vld [vmem:[%s3834_s0 + $0x1a0] sm:$0xff]  ;;  %v70_v62 = vld [vmem:[%s3834_s0 + $0x1a8] sm:$0xff]  ;;  %v106_v0 = vpack.c.bf16 %v68_v58, %v67_v57  ;;  %v91_v1 = vpack.c.bf16 %v38_v60, %v37_v59  ;;  %v39_v3 = vld [vmem:[%s3834_s0 + $0xb0] sm:$0xff] }
  0x17   :  { %2308 = vmatmul.mubr.msk.bf16.gmra.mrb[8].mxu1 %vm125_vm0, %v102_v40  ;;  %2279 = vmatprep.mubr.msk.bf16.mxu0 %vm125_vm0, %v87_v41  ;;  %v107_v2 = vpack.c.bf16 %v70_v62, %v69_v61  ;;  %v40_v4 = vld [vmem:[%s3834_s0 + $0xb8] sm:$0xff]  ;;  %v71_v5 = vld [vmem:[%s3834_s0 + $0x1b0] sm:$0xff]  ;;  %v41_v7 = vld [vmem:[%s3834_s0 + $0xc0] sm:$0xff] }
  0x18   :  { %2311 = vmatprep.mubr.msk.bf16.mxu1 %vm125_vm0, %v103_v42  ;;  %v72_v6 = vld [vmem:[%s3834_s0 + $0x1b8] sm:$0xff]  ;;  %v42_v8 = vld [vmem:[%s3834_s0 + $0xc8] sm:$0xff]  ;;  %v73_v9 = vld [vmem:[%s3834_s0 + $0x1c0] sm:$0xff]  ;;  %v92_v11 = vpack.c.bf16 %v40_v4, %v39_v3 }
  0x19   :  { %v74_v10 = vld [vmem:[%s3834_s0 + $0x1c8] sm:$0xff]  ;;  %v108_v12 = vpack.c.bf16 %v72_v6, %v71_v5  ;;  %v93_v13 = vpack.c.bf16 %v42_v8, %v41_v7  ;;  %v43_v15 = vld [vmem:[%s3834_s0 + $0xd0] sm:$0xff]  ;;  %v44_v16 = vld [vmem:[%s3834_s0 + $0xd8] sm:$0xff] }
  0x1a   :  { %v109_v14 = vpack.c.bf16 %v74_v10, %v73_v9  ;;  %v75_v17 = vld [vmem:[%s3834_s0 + $0x1d0] sm:$0xff]  ;;  %v76_v18 = vld [vmem:[%s3834_s0 + $0x1d8] sm:$0xff]  ;;  %v94_v19 = vpack.c.bf16 %v44_v16, %v43_v15  ;;  %v45_v21 = vld [vmem:[%s3834_s0 + $0xe0] sm:$0xff] }
  0x1b   :  { %v110_v20 = vpack.c.bf16 %v76_v18, %v75_v17  ;;  %v46_v22 = vld [vmem:[%s3834_s0 + $0xe8] sm:$0xff]  ;;  %v47_v24 = vld [vmem:[%s3834_s0 + $0xf0] sm:$0xff]  ;;  %v48_v25 = vld [vmem:[%s3834_s0 + $0xf8] sm:$0xff] }
  0x1c   :  { %v95_v23 = vpack.c.bf16 %v46_v22, %v45_v21  ;;  %v96_v26 = vpack.c.bf16 %v48_v25, %v47_v24  ;;  %v77_v27 = vld [vmem:[%s3834_s0 + $0x1e0] sm:$0xff]  ;;  %v78_v28 = vld [vmem:[%s3834_s0 + $0x1e8] sm:$0xff]  ;;  %v79_v30 = vld [vmem:[%s3834_s0 + $0x1f0] sm:$0xff] }
  0x1d   :  { %v111_v29 = vpack.c.bf16 %v78_v28, %v77_v27  ;;  %v80_v31 = vld [vmem:[%s3834_s0 + $0x1f8] sm:$0xff]  ;;  %v2745_v36 = vld [vmem:[%s3836_s2] sm:$0xff]  ;;  %s2489_s0 = smov [#allocation2]  }
  0x1e   :  { %2280 = vmatmul.mubr.msk.bf16.gmra.mrb[12].mxu0 %vm125_vm0, %v88_v51  ;;  %v112_v32 = vpack.c.bf16 %v80_v31, %v79_v30  ;;  %v2748_v37 = vrot.slane %v2745_v36, %v117_v35  ;;  %s1869_s2 = sshll.u32 %s2489_s0, 4  ;;  %s1870_s2 = int_to_ptr.vmem [resolvable:$true] %s1869_s2 }
  0x1f   :  { %2312 = vmatmul.mubr.msk.bf16.gmra.mrb[12].mxu1 %vm125_vm0, %v104_v52  ;;  %2283 = vmatprep.mubr.msk.bf16.mxu0 %vm125_vm0, %v89_v53  ;;  %s2465_s4 = scalar_lea.vmem %s1870_s2, 4096  ;;  %p2470_p1 = scmp.lt.s32.totalorder %s1870_s2, %s1870_s2 }
  0x20   :  { %2315 = vmatprep.mubr.msk.bf16.mxu1 %vm125_vm0, %v105_v54  ;;  %p2466_p0 = scmp.ne.s32.totalorder %s1870_s2, %s2465_s4  ;;  %p2471_p2 = scmp.lt.s32.totalorder %s2465_s4, %s2465_s4 }
  0x22   :  { %p2472_p3 = por %p2471_p2, %p2470_p1 }
  0x24   :  { %p2473_p4 = pnand %p2472_p3, %p2466_p0 }
  0x26   :  { %2284 = vmatmul.mubr.msk.bf16.gmra.mrb[16].mxu0 %vm125_vm0, %v90_v63 }
  0x27   :  { %2316 = vmatmul.mubr.msk.bf16.gmra.mrb[16].mxu1 %vm125_vm0, %v106_v0  ;;  %2287 = vmatprep.mubr.msk.bf16.mxu0 %vm125_vm0, %v91_v1 }
  0x28   :  { %2319 = vmatprep.mubr.msk.bf16.mxu1 %vm125_vm0, %v107_v2 }
  0x2e   :  { %2288 = vmatmul.mubr.msk.bf16.gmra.mrb[20].mxu0 %vm125_vm0, %v92_v11 }
  0x2f   :  { %2320 = vmatmul.mubr.msk.bf16.gmra.mrb[20].mxu1 %vm125_vm0, %v108_v12  ;;  %2291 = vmatprep.mubr.msk.bf16.mxu0 %vm125_vm0, %v93_v13 }
  0x30   :  { %2323 = vmatprep.mubr.msk.bf16.mxu1 %vm125_vm0, %v109_v14 }
  0x36   :  { %2292 = vmatmul.mubr.msk.bf16.gmra.mrb[24].mxu0 %vm125_vm0, %v94_v19 }
  0x37   :  { %2324 = vmatmul.mubr.msk.bf16.gmra.mrb[24].mxu1 %vm125_vm0, %v110_v20  ;;  %2295 = vmatprep.mubr.msk.bf16.mxu0 %vm125_vm0, %v95_v23 }
  0x38   :  { %2327 = vmatprep.mubr.msk.bf16.mxu1 %vm125_vm0, %v111_v29 }
  0x3e   :  { %2296 = vmatmul.mubr.msk.bf16.gmra.mrb[28].mxu0 %vm125_vm0, %v96_v26 }
  0x3f   :  { %2328 = vmatmul.mubr.msk.bf16.gmra.mrb[28].mxu1 %vm125_vm0, %v112_v32 }
  0xd9   :  { %v2269_v38 = vpop.f32.mrb[0].mxu0 }
  0xda   :  { %v2301_v39 = vpop.f32.mrb[0].mxu1  ;;  %v2751_v40 = vadd.f32 %v2269_v38, %v2748_v37  ;;  %v256_v42 = vpop.f32.mrb[1].mxu0 }
  0xdb   :  { %v2754_v41 = vadd.f32 %v2301_v39, %v2748_v37  ;;  %v384_v43 = vpop.f32.mrb[1].mxu1  ;;  %v2270_v44 = vpop.f32.mrb[2].mxu0  ;;  %v2759_v48 = vadd.f32 %v256_v42, %v2748_v37 }
  0xdc   :  { %v2302_v45 = vpop.f32.mrb[2].mxu1  ;;  %v259_v46 = vpop.f32.mrb[3].mxu0  ;;  %515 = vadd.xlane.f32.xlu1 %v2751_v40  ;;  %v2762_v49 = vadd.f32 %v2270_v44, %v2748_v37  ;;  %v2767_v52 = vadd.f32 %v384_v43, %v2748_v37  ;;  %v706_v61 = vmul.f32 %v2751_v40, %v2751_v40 }
  0xdd   :  { %v387_v47 = vpop.f32.mrb[3].mxu1  ;;  %579 = vadd.xlane.f32.xlu0 %v2754_v41  ;;  %v2770_v53 = vadd.f32 %v2302_v45, %v2748_v37  ;;  %v738_v1 = vmul.f32 %v2754_v41, %v2754_v41  ;;  %v2805_v8 = vadd.f32 %v259_v46, %v2748_v37  ;;  %v704_v13 = vmul.f32 %v2759_v48, %v2759_v48 }
  0xde   :  { %v2779_v60 = vadd.f32 %v387_v47, %v2748_v37  ;;  %v707_v0 = vmul.f32 %v2762_v49, %v2762_v49  ;;  %v736_v21 = vmul.f32 %v2767_v52, %v2767_v52 }
  0xdf   :  { %v739_v9 = vmul.f32 %v2770_v53, %v2770_v53  ;;  %v705_v12 = vmul.f32 %v2805_v8, %v2805_v8 }
  0xe0   :  { %517 = vadd.xlane.f32.xlu1 %v2762_v49  ;;  %v737_v20 = vmul.f32 %v2779_v60, %v2779_v60 }
  0xe1   :  { %511 = vadd.xlane.f32.xlu0 %v2759_v48  ;;  %v2273_v50 = vpop.f32.mrb[4].mxu0 }
  0xe2   :  { %v2305_v51 = vpop.f32.mrb[4].mxu1  ;;  %v272_v54 = vpop.f32.mrb[5].mxu0  ;;  %v2839_v24 = vadd.f32 %v2273_v50, %v2748_v37 }
  0xe3   :  { %v2772_v55 = vpop.f32.mrb[5].mxu1  ;;  %v2274_v56 = vpop.f32.mrb[6].mxu0  ;;  %v2859_v32 = vadd.f32 %v2305_v51, %v2748_v37  ;;  %v2871_v39 = vadd.f32 %v272_v54, %v2748_v37 }
  0xe4   :  { %v2306_v57 = vpop.f32.mrb[6].mxu1  ;;  %581 = vadd.xlane.f32.xlu1 %v2770_v53  ;;  %v275_v58 = vpop.f32.mrb[7].mxu0  ;;  %v2842_v25 = vadd.f32 %v2274_v56, %v2748_v37  ;;  %v2892_v51 = vadd.f32 %v2772_v55, %v2748_v37 }
  0xe5   :  { %575 = vadd.xlane.f32.xlu0 %v2767_v52  ;;  %v2776_v59 = vpop.f32.mrb[7].mxu1  ;;  %v2862_v33 = vadd.f32 %v2306_v57, %v2748_v37  ;;  %v2874_v42 = vadd.f32 %v275_v58, %v2748_v37  ;;  %v710_v57 = vmul.f32 %v2839_v24, %v2839_v24  ;;  %v742_v58 = vmul.f32 %v2859_v32, %v2859_v32 }
  0xe6   :  { %3863 = vst [vmem:[#allocation5_spill] sm:$0xff] %v2892_v51  ;;  %v2896_v54 = vadd.f32 %v2776_v59, %v2748_v37  ;;  %v711_v56 = vmul.f32 %v2842_v25, %v2842_v25 }
  0xe7   :  { %v743_v55 = vmul.f32 %v2862_v33, %v2862_v33  ;;  %v709_v59 = vmul.f32 %v2874_v42, %v2874_v42 }
  0xe8   :  { %577 = vadd.xlane.f32.xlu1 %v2779_v60 }
  0xe9   :  { %772 = vadd.xlane.f32.xlu0 %v706_v61  ;;  %v2784_v62 = vpop.f32.mrb[8].mxu0  ;;  %v708_v61 = vmul.f32 %v2871_v39, %v2871_v39 }
  0xea   :  { %v2786_v63 = vpop.f32.mrb[8].mxu1  ;;  %v2792_v2 = vpop.f32.mrb[9].mxu0 }
  0xeb   :  { %v2794_v3 = vpop.f32.mrb[9].mxu1  ;;  %v2796_v4 = vpop.f32.mrb[10].mxu0 }
  0xec   :  { %v2798_v5 = vpop.f32.mrb[10].mxu1  ;;  %774 = vadd.xlane.f32.xlu1 %v707_v0  ;;  %v2800_v6 = vpop.f32.mrb[11].mxu0 }
  0xed   :  { %836 = vadd.xlane.f32.xlu0 %v738_v1  ;;  %v2802_v7 = vpop.f32.mrb[11].mxu1  ;;  %v741_v1 = vmul.f32 %v2896_v54, %v2896_v54 }
  0xf0   :  { %838 = vadd.xlane.f32.xlu1 %v739_v9  ;;  %v740_v9 = vmul.f32 %v2892_v51, %v2892_v51 }
  0xf1   :  { %513 = vadd.xlane.f32.xlu0 %v2805_v8  ;;  %v2810_v10 = vpop.f32.mrb[12].mxu0 }
  0xf2   :  { %v2812_v11 = vpop.f32.mrb[12].mxu1  ;;  %v2818_v14 = vpop.f32.mrb[13].mxu0 }
  0xf3   :  { %v2820_v15 = vpop.f32.mrb[13].mxu1  ;;  %v2822_v16 = vpop.f32.mrb[14].mxu0 }
  0xf4   :  { %v2824_v17 = vpop.f32.mrb[14].mxu1  ;;  %770 = vadd.xlane.f32.xlu1 %v705_v12  ;;  %v2826_v18 = vpop.f32.mrb[15].mxu0 }
  0xf5   :  { %768 = vadd.xlane.f32.xlu0 %v704_v13  ;;  %v2828_v19 = vpop.f32.mrb[15].mxu1 }
  0xf8   :  { %834 = vadd.xlane.f32.xlu1 %v737_v20 }
  0xf9   :  { %832 = vadd.xlane.f32.xlu0 %v736_v21  ;;  %v2834_v22 = vpop.f32.mrb[16].mxu0 }
  0xfa   :  { %v2836_v23 = vpop.f32.mrb[16].mxu1  ;;  %v2844_v26 = vpop.f32.mrb[17].mxu0 }
  0xfb   :  { %v2846_v27 = vpop.f32.mrb[17].mxu1  ;;  %v2848_v28 = vpop.f32.mrb[18].mxu0 }
  0xfc   :  { %v2850_v29 = vpop.f32.mrb[18].mxu1  ;;  %525 = vadd.xlane.f32.xlu1 %v2842_v25  ;;  %v2854_v30 = vpop.f32.mrb[19].mxu0 }
  0xfd   :  { %523 = vadd.xlane.f32.xlu0 %v2839_v24  ;;  %v2856_v31 = vpop.f32.mrb[19].mxu1 }
 0x100   :  { %589 = vadd.xlane.f32.xlu1 %v2862_v33 }
 0x101   :  { %587 = vadd.xlane.f32.xlu0 %v2859_v32  ;;  %v2866_v35 = vpop.f32.mrb[20].mxu0 }
 0x102   :  { %v2868_v38 = vpop.f32.mrb[20].mxu1  ;;  %v2876_v43 = vpop.f32.mrb[21].mxu0 }
 0x103   :  { %v2878_v44 = vpop.f32.mrb[21].mxu1  ;;  %v2880_v45 = vpop.f32.mrb[22].mxu0 }
 0x104   :  { %v2882_v46 = vpop.f32.mrb[22].mxu1  ;;  %521 = vadd.xlane.f32.xlu1 %v2874_v42  ;;  %v2886_v47 = vpop.f32.mrb[23].mxu0 }
 0x105   :  { %519 = vadd.xlane.f32.xlu0 %v2871_v39  ;;  %v2888_v50 = vpop.f32.mrb[23].mxu1 }
 0x108   :  { %585 = vadd.xlane.f32.xlu1 %v2896_v54 }
 0x109   :  { %583 = vadd.xlane.f32.xlu0 %v2892_v51  ;;  %v2912_v0 = vpop.f32.mrb[24].mxu0 }
 0x10a   :  { %v2918_v12 = vpop.f32.mrb[25].mxu0  ;;  %v2924_v21 = vpop.f32.mrb[24].mxu1 }
 0x10b   :  { %v2920_v13 = vpop.f32.mrb[26].mxu0 }
 0x10c   :  { %782 = vadd.xlane.f32.xlu1 %v711_v56  ;;  %v2922_v20 = vpop.f32.mrb[27].mxu0  ;;  %v2928_v56 = vadd.f32 %v2784_v62, %v2748_v37  ;;  %v2948_v62 = vadd.f32 %v2798_v5, %v2748_v37  ;;  %v2968_v5 = vadd.f32 %v2802_v7, %v2748_v37 }
 0x10d   :  { %780 = vadd.xlane.f32.xlu0 %v710_v57  ;;  %v2932_v57 = vadd.f32 %v2796_v4, %v2748_v37  ;;  %v2954_v4 = vadd.f32 %v2792_v2, %v2748_v37 }
 0x10e   :  { %3864 = vst [vmem:[#allocation6_spill] sm:$0xff] %v2928_v56  ;;  %3867 = vst [vmem:[#allocation9_spill] sm:$0xff] %v2948_v62 }
 0x10f   :  { %3865 = vst [vmem:[#allocation7_spill] sm:$0xff] %v2932_v57  ;;  %3868 = vst [vmem:[#allocation10_spill] sm:$0xff] %v2954_v4  ;;  %v715_v2 = vmul.f32 %v2932_v57, %v2932_v57  ;;  %v712_v51 = vmul.f32 %v2954_v4, %v2954_v4 }
 0x110   :  { %846 = vadd.xlane.f32.xlu1 %v743_v55  ;;  %v2934_v55 = vpop.f32.mrb[25].mxu1  ;;  %3871 = vst [vmem:[#allocation13_spill] sm:$0xff] %v2968_v5 }
 0x111   :  { %844 = vadd.xlane.f32.xlu0 %v742_v58  ;;  %v2936_v58 = vpop.f32.mrb[26].mxu1 }
 0x114   :  { %778 = vadd.xlane.f32.xlu1 %v709_v59  ;;  %v2940_v59 = vpop.f32.mrb[27].mxu1 }
 0x115   :  { %776 = vadd.xlane.f32.xlu0 %v708_v61  ;;  %v2944_v61 = vadd.f32 %v2786_v63, %v2748_v37  ;;  %v2964_v63 = vadd.f32 %v2794_v3, %v2748_v37  ;;  %v747_v3 = vmul.f32 %v2948_v62, %v2948_v62 }
 0x117   :  { %3866 = vst [vmem:[#allocation8_spill] sm:$0xff] %v2944_v61  ;;  %3870 = vst [vmem:[#allocation12_spill] sm:$0xff] %v2964_v63 }
 0x118   :  { %842 = vadd.xlane.f32.xlu1 %v741_v1  ;;  %v2958_v1 = vadd.f32 %v2800_v6, %v2748_v37  ;;  %v714_v6 = vmul.f32 %v2928_v56, %v2928_v56 }
 0x119   :  { %840 = vadd.xlane.f32.xlu0 %v740_v9  ;;  %v746_v9 = vmul.f32 %v2944_v61, %v2944_v61 }
 0x11a   :  { %3869 = vst [vmem:[#allocation11_spill] sm:$0xff] %v2958_v1  ;;  %v713_v7 = vmul.f32 %v2958_v1, %v2958_v1 }
 0x11c   :  { %533 = vadd.xlane.f32.xlu1 %v2932_v57  ;;  %v2984_v57 = vpop.f32.mrb[28].mxu0 }
 0x11d   :  { %531 = vadd.xlane.f32.xlu0 %v2928_v56 }
 0x120   :  { %597 = vadd.xlane.f32.xlu1 %v2948_v62  ;;  %v2990_v62 = vpop.f32.mrb[29].mxu0 }
 0x121   :  { %595 = vadd.xlane.f32.xlu0 %v2944_v61  ;;  %3872 = vst [vmem:[#allocation14_spill] sm:$0xff] %v2990_v62 }
 0x124   :  { %529 = vadd.xlane.f32.xlu1 %v2958_v1  ;;  %v2996_v1 = vpop.f32.mrb[28].mxu1 }
 0x125   :  { %527 = vadd.xlane.f32.xlu0 %v2954_v4  ;;  %3873 = vst [vmem:[#allocation15_spill] sm:$0xff] %v2996_v1  ;;  %v3030_v4 = vadd.f32 %v2826_v18, %v2748_v37 }
 0x127   :  { %3881 = vst [vmem:[#allocation23_spill] sm:$0xff] %v3030_v4 }
 0x128   :  { %593 = vadd.xlane.f32.xlu1 %v2968_v5 }
 0x129   :  { %591 = vadd.xlane.f32.xlu0 %v2964_v63 }
 0x12c   :  { %790 = vadd.xlane.f32.xlu1 %v715_v2  ;;  %v745_v2 = vmul.f32 %v2968_v5, %v2968_v5  ;;  %v3006_v5 = vpop.f32.mrb[29].mxu1 }
 0x12d   :  { %788 = vadd.xlane.f32.xlu0 %v714_v6  ;;  %v744_v6 = vmul.f32 %v2964_v63, %v2964_v63  ;;  %3876 = vst [vmem:[#allocation18_spill] sm:$0xff] %v3006_v5  ;;  %v3008_v63 = vpop.f32.mrb[30].mxu1 }
 0x130   :  { %854 = vadd.xlane.f32.xlu1 %v747_v3  ;;  %v2992_v3 = vpop.f32.mrb[30].mxu0 }
 0x131   :  { %852 = vadd.xlane.f32.xlu0 %v746_v9  ;;  %v2994_v9 = vpop.f32.mrb[31].mxu0 }
 0x134   :  { %786 = vadd.xlane.f32.xlu1 %v713_v7  ;;  %v3004_v7 = vadd.f32 %v2822_v16, %v2748_v37  ;;  %v3026_v16 = vadd.f32 %v2818_v14, %v2748_v37 }
 0x135   :  { %784 = vadd.xlane.f32.xlu0 %v712_v51  ;;  %v3000_v51 = vadd.f32 %v2810_v10, %v2748_v37  ;;  %v3020_v10 = vadd.f32 %v2824_v17, %v2748_v37  ;;  %v3040_v17 = vadd.f32 %v2828_v19, %v2748_v37  ;;  %v717_v19 = vmul.f32 %v3030_v4, %v3030_v4 }
 0x136   :  { %3875 = vst [vmem:[#allocation17_spill] sm:$0xff] %v3004_v7  ;;  %3880 = vst [vmem:[#allocation22_spill] sm:$0xff] %v3026_v16  ;;  %v719_v14 = vmul.f32 %v3004_v7, %v3004_v7  ;;  %v716_v56 = vmul.f32 %v3026_v16, %v3026_v16 }
 0x137   :  { %3874 = vst [vmem:[#allocation16_spill] sm:$0xff] %v3000_v51  ;;  %3879 = vst [vmem:[#allocation21_spill] sm:$0xff] %v3020_v10  ;;  %v718_v18 = vmul.f32 %v3000_v51, %v3000_v51 }
 0x138   :  { %850 = vadd.xlane.f32.xlu1 %v745_v2  ;;  %v3012_v2 = vpop.f32.mrb[31].mxu1  ;;  %3883 = vst [vmem:[#allocation25_spill] sm:$0xff] %v3040_v17 }
 0x139   :  { %848 = vadd.xlane.f32.xlu0 %v744_v6  ;;  %3877 = vst [vmem:[#allocation19_spill] sm:$0xff] %v3012_v2  ;;  %v3016_v6 = vadd.f32 %v2812_v11, %v2748_v37  ;;  %v3036_v11 = vadd.f32 %v2820_v15, %v2748_v37  ;;  %v751_v15 = vmul.f32 %v3020_v10, %v3020_v10  ;;  %v1410_v2 = vsub.s32 1, %v2739_v34 }
 0x13b   :  { %3878 = vst [vmem:[#allocation20_spill] sm:$0xff] %v3016_v6  ;;  %3882 = vst [vmem:[#allocation24_spill] sm:$0xff] %v3036_v11  ;;  %v750_v61 = vmul.f32 %v3016_v6, %v3016_v6 }
 0x13c   :  { %541 = vadd.xlane.f32.xlu1 %v3004_v7  ;;  %v3145_v7 = vadd.f32 %v2882_v46, %v2748_v37 }
 0x13d   :  { %539 = vadd.xlane.f32.xlu0 %v3000_v51 }
 0x140   :  { %605 = vadd.xlane.f32.xlu1 %v3020_v10 }
 0x141   :  { %603 = vadd.xlane.f32.xlu0 %v3016_v6 }
 0x144   :  { %537 = vadd.xlane.f32.xlu1 %v3030_v4 }
 0x145   :  { %535 = vadd.xlane.f32.xlu0 %v3026_v16 }
 0x148   :  { %601 = vadd.xlane.f32.xlu1 %v3040_v17 }
 0x149   :  { %599 = vadd.xlane.f32.xlu0 %v3036_v11 }
 0x14c   :  { %798 = vadd.xlane.f32.xlu1 %v719_v14  ;;  %v749_v14 = vmul.f32 %v3040_v17, %v3040_v17 }
 0x14d   :  { %796 = vadd.xlane.f32.xlu0 %v718_v18  ;;  %v748_v18 = vmul.f32 %v3036_v11, %v3036_v11 }
 0x150   :  { %862 = vadd.xlane.f32.xlu1 %v751_v15  ;;  %v3062_v15 = vadd.f32 %v2834_v22, %v2748_v37  ;;  %v3082_v22 = vadd.f32 %v2844_v26, %v2748_v37 }
 0x151   :  { %860 = vadd.xlane.f32.xlu0 %v750_v61  ;;  %v3066_v61 = vadd.f32 %v2848_v28, %v2748_v37  ;;  %v3086_v28 = vadd.f32 %v2854_v30, %v2748_v37 }
 0x152   :  { %3884 = vst [vmem:[#allocation26_spill] sm:$0xff] %v3062_v15  ;;  %3888 = vst [vmem:[#allocation30_spill] sm:$0xff] %v3082_v22 }
 0x153   :  { %3885 = vst [vmem:[#allocation27_spill] sm:$0xff] %v3066_v61  ;;  %3889 = vst [vmem:[#allocation31_spill] sm:$0xff] %v3086_v28  ;;  %v723_v30 = vmul.f32 %v3066_v61, %v3066_v61 }
 0x154   :  { %794 = vadd.xlane.f32.xlu1 %v717_v19  ;;  %v3076_v19 = vadd.f32 %v2850_v29, %v2748_v37  ;;  %v3096_v29 = vadd.f32 %v2856_v31, %v2748_v37 }
 0x155   :  { %792 = vadd.xlane.f32.xlu0 %v716_v56  ;;  %v3072_v56 = vadd.f32 %v2836_v23, %v2748_v37  ;;  %v3092_v23 = vadd.f32 %v2846_v27, %v2748_v37 }
 0x156   :  { %3887 = vst [vmem:[#allocation29_spill] sm:$0xff] %v3076_v19  ;;  %3891 = vst [vmem:[#allocation33_spill] sm:$0xff] %v3096_v29  ;;  %v755_v31 = vmul.f32 %v3076_v19, %v3076_v19 }
 0x157   :  { %3886 = vst [vmem:[#allocation28_spill] sm:$0xff] %v3072_v56  ;;  %3890 = vst [vmem:[#allocation32_spill] sm:$0xff] %v3092_v23  ;;  %v754_v17 = vmul.f32 %v3072_v56, %v3072_v56 }
 0x158   :  { %858 = vadd.xlane.f32.xlu1 %v749_v14 }
 0x159   :  { %856 = vadd.xlane.f32.xlu0 %v748_v18  ;;  %v722_v18 = vmul.f32 %v3062_v15, %v3062_v15 }
 0x15c   :  { %549 = vadd.xlane.f32.xlu1 %v3066_v61  ;;  %v721_v61 = vmul.f32 %v3086_v28, %v3086_v28 }
 0x15d   :  { %547 = vadd.xlane.f32.xlu0 %v3062_v15 }
 0x160   :  { %613 = vadd.xlane.f32.xlu1 %v3076_v19 }
 0x161   :  { %611 = vadd.xlane.f32.xlu0 %v3072_v56 }
 0x164   :  { %545 = vadd.xlane.f32.xlu1 %v3086_v28  ;;  %v752_v28 = vmul.f32 %v3092_v23, %v3092_v23 }
 0x165   :  { %543 = vadd.xlane.f32.xlu0 %v3082_v22 }
 0x168   :  { %609 = vadd.xlane.f32.xlu1 %v3096_v29 }
 0x169   :  { %607 = vadd.xlane.f32.xlu0 %v3092_v23  ;;  %v516_v14 = vpop.xlane.xlu1 %515 }
 0x16a   :  { %v580_v26 = vpop.xlane.xlu0 %579  ;;  %v3108_v6 = vmul.f32 0.0078125, %v516_v14  ;;  %v753_v14 = vmul.f32 %v3096_v29, %v3096_v29 }
 0x16c   :  { %806 = vadd.xlane.f32.xlu1 %v723_v30  ;;  %v720_v30 = vmul.f32 %v3082_v22, %v3082_v22 }
 0x16d   :  { %804 = vadd.xlane.f32.xlu0 %v722_v18  ;;  %v518_v27 = vpop.xlane.xlu1 %517  ;;  %v3114_v18 = vmul.f32 0.0078125, %v580_v26 }
 0x16e   :  { %v512_v11 = vpop.xlane.xlu0 %511 }
 0x170   :  { %870 = vadd.xlane.f32.xlu1 %v755_v31  ;;  %v962_v31 = vmul.f32 %v3108_v6, %v3108_v6 }
 0x171   :  { %868 = vadd.xlane.f32.xlu0 %v754_v17  ;;  %v582_v16 = vpop.xlane.xlu1 %581  ;;  %v3118_v17 = vmul.f32 0.0078125, %v518_v27 }
 0x172   :  { %v576_v4 = vpop.xlane.xlu0 %575  ;;  %v3126_v26 = vmul.f32 0.0078125, %v582_v16 }
 0x173   :  { %v963_v29 = vmul.f32 %v3118_v17, %v3118_v17 }
 0x174   :  { %802 = vadd.xlane.f32.xlu1 %v721_v61  ;;  %v994_v61 = vmul.f32 %v3114_v18, %v3114_v18 }
 0x175   :  { %800 = vadd.xlane.f32.xlu0 %v720_v30  ;;  %v578_v19 = vpop.xlane.xlu1 %577  ;;  %v3130_v30 = vadd.f32 %v2880_v45, %v2748_v37  ;;  %v3139_v45 = vmul.f32 0.0078125, %v512_v11 }
 0x176   :  { %v773_v15 = vpop.xlane.xlu0 %772  ;;  %v3157_v5 = vmul.f32 0.0078125, %v578_v19  ;;  %v3170_v19 = vadd.f32 %v2876_v43, %v2748_v37 }
 0x177   :  { %v898_v56 = vmul.f32 0.0078125, %v773_v15  ;;  %v960_v46 = vmul.f32 %v3139_v45, %v3139_v45 }
 0x178   :  { %866 = vadd.xlane.f32.xlu1 %v753_v14 }
 0x179   :  { %v1026_v10 = vsub.f32 %v898_v56, %v962_v31  ;;  %864 = vadd.xlane.f32.xlu0 %v752_v28  ;;  %v775_v27 = vpop.xlane.xlu1 %774  ;;  %v3136_v56 = vadd.f32 %v2866_v35, %v2748_v37  ;;  %v995_v28 = vmul.f32 %v3126_v26, %v3126_v26 }
 0x17a   :  { %v837_v15 = vpop.xlane.xlu0 %836  ;;  %v899_v51 = vmul.f32 0.0078125, %v775_v27 }
 0x17b   :  { %v1090_v22 = vmax.f32 %v1026_v10, 0.0  ;;  %v930_v23 = vmul.f32 0.0078125, %v837_v15 }
 0x17c   :  { %v1027_v16 = vsub.f32 %v899_v51, %v963_v29  ;;  %557 = vadd.xlane.f32.xlu1 %v3130_v30 }
 0x17d   :  { %v1218_v31 = vadd.f32 1e-05, %v1090_v22  ;;  %v1058_v14 = vsub.f32 %v930_v23, %v994_v61  ;;  %555 = vadd.xlane.f32.xlu0 %v3136_v56  ;;  %v839_v10 = vpop.xlane.xlu1 %838  ;;  %v3150_v23 = vadd.f32 %v2868_v38, %v2748_v37 }
 0x17e   :  { %v514_v27 = vpop.xlane.xlu0 %513  ;;  %v1091_v35 = vmax.f32 %v1027_v16, 0.0  ;;  %v931_v51 = vmul.f32 0.0078125, %v839_v10 }
 0x17f   :  { %2337 = vrsqrt.f32 %v1218_v31  ;;  %v1122_v22 = vmax.f32 %v1058_v14, 0.0  ;;  %v3152_v11 = vmul.f32 0.0078125, %v514_v27  ;;  %v3161_v31 = vadd.f32 %v2886_v47, %v2748_v37 }
 0x180   :  { %v1219_v29 = vadd.f32 1e-05, %v1091_v35  ;;  %v1059_v15 = vsub.f32 %v931_v51, %v995_v28  ;;  %621 = vadd.xlane.f32.xlu1 %v3145_v7  ;;  %v3166_v35 = vmul.f32 0.0078125, %v576_v4 }
 0x181   :  { %v1250_v61 = vadd.f32 1e-05, %v1122_v22  ;;  %v961_v38 = vmul.f32 %v3152_v11, %v3152_v11  ;;  %619 = vadd.xlane.f32.xlu0 %v3150_v23  ;;  %v771_v16 = vpop.xlane.xlu1 %770 }
 0x182   :  { %v769_v14 = vpop.xlane.xlu0 %768  ;;  %2339 = vrsqrt.f32 %v1219_v29  ;;  %v1123_v28 = vmax.f32 %v1059_v15, 0.0  ;;  %v897_v10 = vmul.f32 0.0078125, %v771_v16  ;;  %v993_v29 = vmul.f32 %v3157_v5, %v3157_v5 }
 0x183   :  { %v896_v27 = vmul.f32 0.0078125, %v769_v14  ;;  %2341 = vrsqrt.f32 %v1250_v61  ;;  %v3178_v15 = vadd.f32 %v2888_v50, %v2748_v37  ;;  %v992_v14 = vmul.f32 %v3166_v35, %v3166_v35 }
 0x184   :  { %v1251_v47 = vadd.f32 1e-05, %v1123_v28  ;;  %v1025_v22 = vsub.f32 %v897_v10, %v961_v38  ;;  %553 = vadd.xlane.f32.xlu1 %v3161_v31  ;;  %v3187_v28 = vadd.f32 %v2878_v44, %v2748_v37 }
 0x185   :  { %v1024_v51 = vsub.f32 %v896_v27, %v960_v46  ;;  %551 = vadd.xlane.f32.xlu0 %v3170_v19  ;;  %v835_v4 = vpop.xlane.xlu1 %834  ;;  %v1154_v46 = vsub.f32 %v2751_v40, %v3108_v6 }
 0x186   :  { %v833_v43 = vpop.xlane.xlu0 %832  ;;  %2343 = vrsqrt.f32 %v1251_v47  ;;  %v1089_v61 = vmax.f32 %v1025_v22, 0.0  ;;  %v929_v38 = vmul.f32 0.0078125, %v835_v4  ;;  %v3191_v47 = vrot.slane %v2745_v36, %v1410_v2 }
 0x187   :  { %v1088_v16 = vmax.f32 %v1024_v51, 0.0  ;;  %v928_v50 = vmul.f32 0.0078125, %v833_v43  ;;  %v1478_v22 = vsub.s32 2, %v2739_v34  ;;  %v727_v43 = vmul.f32 %v3130_v30, %v3130_v30 }
 0x188   :  { %v1217_v27 = vadd.f32 1e-05, %v1089_v61  ;;  %v1057_v1 = vsub.f32 %v929_v38, %v993_v29  ;;  %617 = vadd.xlane.f32.xlu1 %v3178_v15  ;;  %v1155_v29 = vsub.f32 %v2762_v49, %v3118_v17  ;;  %v726_v2 = vmul.f32 %v3136_v56, %v3136_v56 }
 0x189   :  { %v2338_v10 = vpop.eup %2337  ;;  %v1216_v62 = vadd.f32 1e-05, %v1088_v16  ;;  %v1056_v6 = vsub.f32 %v928_v50, %v992_v14  ;;  %615 = vadd.xlane.f32.xlu0 %v3187_v28  ;;  %v526_v51 = vpop.xlane.xlu1 %525  ;;  %v1186_v16 = vsub.f32 %v2754_v41, %v3114_v18  ;;  %v1187_v41 = vsub.f32 %v2770_v53, %v3126_v26 }
 0x18a   :  { %v1346_v40 = vmul.f32 %v2338_v10, %v1154_v46  ;;  %v524_v4 = vpop.xlane.xlu0 %523  ;;  %2345 = vrsqrt.f32 %v1217_v27  ;;  %v1121_v44 = vmax.f32 %v1057_v1, 0.0  ;;  %v3204_v1 = vrot.slane %v2745_v36, %v1478_v22 }
 0x18b   :  { %2347 = vrsqrt.f32 %v1216_v62  ;;  %v1120_v61 = vmax.f32 %v1056_v6, 0.0  ;;  %v759_v27 = vmul.f32 %v3145_v7, %v3145_v7  ;;  %v758_v36 = vmul.f32 %v3150_v23, %v3150_v23 }
 0x18c   :  { %v2340_v34 = vpop.eup %2339  ;;  %v1249_v38 = vadd.f32 1e-05, %v1121_v44  ;;  %814 = vadd.xlane.f32.xlu1 %v727_v43  ;;  %v1414_v14 = vmul.f32 %v3191_v47, %v1346_v40  ;;  %v725_v53 = vmul.f32 %v3161_v31, %v3161_v31 }
 0x18d   :  { %v2342_v46 = vpop.eup %2341  ;;  %v1347_v50 = vmul.f32 %v2340_v34, %v1155_v29  ;;  %v1248_v10 = vadd.f32 1e-05, %v1120_v61  ;;  %812 = vadd.xlane.f32.xlu0 %v726_v2  ;;  %v590_v49 = vpop.xlane.xlu1 %589  ;;  %v1153_v34 = vsub.f32 %v2805_v8, %v3152_v11 }
 0x18e   :  { %v588_v62 = vpop.xlane.xlu0 %587  ;;  %v1378_v17 = vmul.f32 %v2342_v46, %v1186_v16  ;;  %2349 = vrsqrt.f32 %v1249_v38  ;;  %v1482_v40 = vadd.f32 %v3204_v1, %v1414_v14  ;;  %v724_v16 = vmul.f32 %v3170_v19, %v3170_v19 }
 0x18f   :  { %v1415_v18 = vmul.f32 %v3191_v47, %v1347_v50  ;;  %2351 = vrsqrt.f32 %v1248_v10  ;;  %v1152_v46 = vsub.f32 %v2759_v48, %v3139_v45  ;;  %v3226_v14 = vmul.f32 0.0078125, %v526_v51 }
 0x190   :  { %v2344_v22 = vpop.eup %2343  ;;  %878 = vadd.xlane.f32.xlu1 %v759_v27  ;;  %v1446_v44 = vmul.f32 %v3191_v47, %v1378_v17  ;;  %v757_v48 = vmul.f32 %v3178_v15, %v3178_v15  ;;  %v1185_v45 = vsub.f32 %v2779_v60, %v3157_v5 }
 0x191   :  { %v1483_v6 = vadd.f32 %v3204_v1, %v1415_v18  ;;  %v1379_v43 = vmul.f32 %v2344_v22, %v1187_v41  ;;  %876 = vadd.xlane.f32.xlu0 %v758_v36  ;;  %v522_v29 = vpop.xlane.xlu1 %521  ;;  %v3230_v41 = vmul.f32 0.0078125, %v524_v4  ;;  %v756_v22 = vmul.f32 %v3187_v28, %v3187_v28 }
 0x192   :  { %v520_v61 = vpop.xlane.xlu0 %519  ;;  %v1514_v10 = vadd.f32 %v3204_v1, %v1446_v44  ;;  %v1184_v4 = vsub.f32 %v2767_v52, %v3166_v35  ;;  %v967_v44 = vmul.f32 %v3226_v14, %v3226_v14 }
 0x193   :  { %v2049_v26 = vpack.c.bf16 %v1483_v6, %v1482_v40  ;;  %v1447_v2 = vmul.f32 %v3191_v47, %v1379_v43  ;;  %v3248_v43 = vadd.f32 %v2920_v13, %v2748_v37 }
 0x194   :  { %v2346_v38 = vpop.eup %2345  ;;  %810 = vadd.xlane.f32.xlu1 %v725_v53 }
 0x195   :  { %v2348_v50 = vpop.eup %2347  ;;  %2201 = vst [vmem:[#allocation2 + $0x8] sm:$0xff] %v2049_v26   ;;  %v1515_v17 = vadd.f32 %v3204_v1, %v1447_v2  ;;  %v1345_v27 = vmul.f32 %v2346_v38, %v1153_v34  ;;  %808 = vadd.xlane.f32.xlu0 %v724_v16  ;;  %v586_v8 = vpop.xlane.xlu1 %585  ;;  %v966_v26 = vmul.f32 %v3230_v41, %v3230_v41  ;;  %v3253_v2 = vmul.f32 0.0078125, %v590_v49 }
 0x196   :  { %v3232_v11 = vpop.xlane.xlu0 %583  ;;  %v1344_v18 = vmul.f32 %v2348_v50, %v1152_v46  ;;  %v3257_v50 = vmul.f32 0.0078125, %v588_v62  ;;  %v3265_v49 = vadd.f32 %v2936_v58, %v2748_v37 }
 0x197   :  { %v2129_v51 = vpack.c.bf16 %v1515_v17, %v1514_v10  ;;  %v1413_v36 = vmul.f32 %v3191_v47, %v1345_v27  ;;  %v3261_v10 = vadd.f32 %v2912_v0, %v2748_v37  ;;  %v999_v62 = vmul.f32 %v3253_v2, %v3253_v2 }
 0x198   :  { %v2350_v40 = vpop.eup %2349  ;;  %v1412_v6 = vmul.f32 %v3191_v47, %v1344_v18  ;;  %874 = vadd.xlane.f32.xlu1 %v757_v48  ;;  %v3274_v0 = vmul.f32 0.0078125, %v520_v61 }
 0x199   :  { %v2352_v60 = vpop.eup %2351  ;;  %2217 = vst [vmem:[#allocation2 + $0x88] sm:$0xff] %v2129_v51   ;;  %v1481_v5 = vadd.f32 %v3204_v1, %v1413_v36  ;;  %v1377_v53 = vmul.f32 %v2350_v40, %v1185_v45  ;;  %872 = vadd.xlane.f32.xlu0 %v756_v22  ;;  %v783_v52 = vpop.xlane.xlu1 %782  ;;  %v3272_v51 = vmul.f32 0.0078125, %v522_v29  ;;  %v3286_v29 = vadd.f32 %v2924_v21, %v2748_v37 }
 0x19a   :  { %v781_v35 = vpop.xlane.xlu0 %780  ;;  %v1480_v34 = vadd.f32 %v3204_v1, %v1412_v6  ;;  %v1376_v16 = vmul.f32 %v2352_v60, %v1184_v4  ;;  %v903_v38 = vmul.f32 0.0078125, %v783_v52  ;;  %v3282_v60 = vadd.f32 %v2922_v20, %v2748_v37 }
 0x19b   :  { %v902_v13 = vmul.f32 0.0078125, %v781_v35  ;;  %v1445_v46 = vmul.f32 %v3191_v47, %v1377_v53  ;;  %v965_v35 = vmul.f32 %v3272_v51, %v3272_v51 }
 0x19c   :  { %v2044_v17 = vpack.c.bf16 %v1481_v5, %v1480_v34  ;;  %v1444_v27 = vmul.f32 %v3191_v47, %v1376_v16  ;;  %v1031_v18 = vsub.f32 %v903_v38, %v967_v44  ;;  %565 = vadd.xlane.f32.xlu1 %v3248_v43  ;;  %v998_v44 = vmul.f32 %v3257_v50, %v3257_v50 }
 0x19d   :  { %v1030_v48 = vsub.f32 %v902_v13, %v966_v26  ;;  %v1513_v45 = vadd.f32 %v3204_v1, %v1445_v46  ;;  %563 = vadd.xlane.f32.xlu0 %v3261_v10  ;;  %v847_v58 = vpop.xlane.xlu1 %846  ;;  %v964_v34 = vmul.f32 %v3274_v0, %v3274_v0  ;;  %v3293_v16 = vmul.f32 0.0078125, %v586_v8 }
 0x19e   :  { %v845_v36 = vpop.xlane.xlu0 %844  ;;  %2045 = vst [vmem:[#allocation2] sm:$0xff] %v2044_v17   ;;  %v1512_v22 = vadd.f32 %v3204_v1, %v1444_v27  ;;  %v1095_v40 = vmax.f32 %v1031_v18, 0.0  ;;  %v935_v6 = vmul.f32 0.0078125, %v847_v58  ;;  %v3298_v27 = vadd.f32 %v2918_v12, %v2748_v37 }
 0x19f   :  { %v1094_v4 = vmax.f32 %v1030_v48, 0.0  ;;  %v934_v61 = vmul.f32 0.0078125, %v845_v36  ;;  %v3301_v18 = vmul.f32 0.0078125, %v3232_v11  ;;  %v997_v58 = vmul.f32 %v3293_v16, %v3293_v16 }
 0x1a0   :  { %v2124_v5 = vpack.c.bf16 %v1513_v45, %v1512_v22  ;;  %v1223_v53 = vadd.f32 1e-05, %v1095_v40  ;;  %v1063_v52 = vsub.f32 %v935_v6, %v999_v62  ;;  %629 = vadd.xlane.f32.xlu1 %v3265_v49  ;;  %v3308_v36 = vadd.f32 %v2940_v59, %v2748_v37 }
 0x1a1   :  { %v1222_v26 = vadd.f32 1e-05, %v1094_v4  ;;  %v1062_v20 = vsub.f32 %v934_v61, %v998_v44  ;;  %627 = vadd.xlane.f32.xlu0 %v3286_v29  ;;  %v779_v21 = vpop.xlane.xlu1 %778  ;;  %v996_v44 = vmul.f32 %v3301_v18, %v3301_v18  ;;  %v3315_v61 = vadd.f32 %v2934_v55, %v2748_v37 }
 0x1a2   :  { %v777_v38 = vpop.xlane.xlu0 %776  ;;  %2216 = vst [vmem:[#allocation2 + $0x80] sm:$0xff] %v2124_v5   ;;  %2353 = vrsqrt.f32 %v1223_v53  ;;  %v1127_v13 = vmax.f32 %v1063_v52, 0.0  ;;  %v901_v46 = vmul.f32 0.0078125, %v779_v21  ;;  %v731_v21 = vmul.f32 %v3248_v43, %v3248_v43 }
 0x1a3   :  { %v900_v17 = vmul.f32 0.0078125, %v777_v38  ;;  %2355 = vrsqrt.f32 %v1222_v26  ;;  %v1126_v8 = vmax.f32 %v1062_v20, 0.0  ;;  %v1159_v55 = vsub.f32 %v2842_v25, %v3226_v14 }
 0x1a4   :  { %v1255_v48 = vadd.f32 1e-05, %v1127_v13  ;;  %v1029_v45 = vsub.f32 %v901_v46, %v965_v35  ;;  %561 = vadd.xlane.f32.xlu1 %v3282_v60  ;;  %v730_v13 = vmul.f32 %v3261_v10, %v3261_v10  ;;  %v763_v25 = vmul.f32 %v3265_v49, %v3265_v49 }
 0x1a5   :  { %v1028_v62 = vsub.f32 %v900_v17, %v964_v34  ;;  %v1254_v22 = vadd.f32 1e-05, %v1126_v8  ;;  %559 = vadd.xlane.f32.xlu0 %v3298_v27  ;;  %v843_v12 = vpop.xlane.xlu1 %842  ;;  %v1158_v17 = vsub.f32 %v2839_v24, %v3230_v41  ;;  %v1191_v14 = vsub.f32 %v2862_v33, %v3253_v2 }
 0x1a6   :  { %v841_v11 = vpop.xlane.xlu0 %840  ;;  %2357 = vrsqrt.f32 %v1255_v48  ;;  %v1093_v40 = vmax.f32 %v1029_v45, 0.0  ;;  %v933_v6 = vmul.f32 0.0078125, %v843_v12  ;;  %v762_v24 = vmul.f32 %v3286_v29, %v3286_v29 }
 0x1a7   :  { %v1092_v4 = vmax.f32 %v1028_v62, 0.0  ;;  %2359 = vrsqrt.f32 %v1254_v22  ;;  %v932_v5 = vmul.f32 0.0078125, %v841_v11 }
 0x1a8   :  { %v1221_v59 = vadd.f32 1e-05, %v1093_v40  ;;  %v1061_v26 = vsub.f32 %v933_v6, %v997_v58  ;;  %625 = vadd.xlane.f32.xlu1 %v3308_v36  ;;  %v1190_v40 = vsub.f32 %v2859_v32, %v3257_v50  ;;  %v728_v50 = vmul.f32 %v3298_v27, %v3298_v27 }
 0x1a9   :  { %v1220_v53 = vadd.f32 1e-05, %v1092_v4  ;;  %v1060_v52 = vsub.f32 %v932_v5, %v996_v44  ;;  %623 = vadd.xlane.f32.xlu0 %v3315_v61  ;;  %v534_v35 = vpop.xlane.xlu1 %533 }
 0x1aa   :  { %v532_v34 = vpop.xlane.xlu0 %531  ;;  %2361 = vrsqrt.f32 %v1221_v59  ;;  %v1125_v20 = vmax.f32 %v1061_v26, 0.0  ;;  %v729_v26 = vmul.f32 %v3282_v60, %v3282_v60 }
 0x1ab   :  { %2363 = vrsqrt.f32 %v1220_v53  ;;  %v1124_v38 = vmax.f32 %v1060_v52, 0.0  ;;  %v1157_v52 = vsub.f32 %v2874_v42, %v3272_v51  ;;  %v3354_v42 = vmul.f32 0.0078125, %v532_v34 }
 0x1ac   :  { %v2354_v46 = vpop.eup %2353  ;;  %v1253_v8 = vadd.f32 1e-05, %v1125_v20  ;;  %822 = vadd.xlane.f32.xlu1 %v731_v21  ;;  %v1156_v21 = vsub.f32 %v2871_v39, %v3274_v0  ;;  %v761_v0 = vmul.f32 %v3308_v36, %v3308_v36  ;;  %v3366_v34 = vadd.f32 %v2992_v3, %v2748_v37 }
 0x1ad   :  { %v2356_v48 = vpop.eup %2355  ;;  %v1351_v45 = vmul.f32 %v2354_v46, %v1159_v55  ;;  %v1252_v62 = vadd.f32 1e-05, %v1124_v38  ;;  %820 = vadd.xlane.f32.xlu0 %v730_v13  ;;  %v598_v58 = vpop.xlane.xlu1 %597  ;;  %v3351_v13 = vmul.f32 0.0078125, %v534_v35  ;;  %v1189_v35 = vsub.f32 %v2896_v54, %v3293_v16 }
 0x1ae   :  { %v3327_v22 = vpop.xlane.xlu0 %595  ;;  %v1350_v12 = vmul.f32 %v2356_v48, %v1158_v17  ;;  %2365 = vrsqrt.f32 %v1253_v8  ;;  %v970_v3 = vmul.f32 %v3354_v42, %v3354_v42 }
 0x1af   :  { %v1419_v11 = vmul.f32 %v3191_v47, %v1351_v45  ;;  %2367 = vrsqrt.f32 %v1252_v62 }
 0x1b0   :  { %v2358_v41 = vpop.eup %2357  ;;  %v1418_v4 = vmul.f32 %v3191_v47, %v1350_v12  ;;  %886 = vadd.xlane.f32.xlu1 %v763_v25  ;;  %v760_v12 = vmul.f32 %v3315_v61, %v3315_v61 }
 0x1b1   :  { %v2360_v6 = vpop.eup %2359  ;;  %v1487_v44 = vadd.f32 %v3204_v1, %v1419_v11  ;;  %v1383_v5 = vmul.f32 %v2358_v41, %v1191_v14  ;;  %884 = vadd.xlane.f32.xlu0 %v762_v24  ;;  %v530_v59 = vpop.xlane.xlu1 %529  ;;  %v3892_v14 = vld [vmem:[#allocation5_spill] sm:$0xff] }
 0x1b2   :  { %v528_v33 = vpop.xlane.xlu0 %527  ;;  %v1486_v2 = vadd.f32 %v3204_v1, %v1418_v4  ;;  %v1382_v53 = vmul.f32 %v2360_v6, %v1190_v40  ;;  %v1188_v11 = vsub.f32 %v3892_v14, %v3301_v18  ;;  %v971_v40 = vmul.f32 %v3351_v13, %v3351_v13 }
 0x1b3   :  { %v1451_v32 = vmul.f32 %v3191_v47, %v1383_v5  ;;  %v3378_v6 = vmul.f32 0.0078125, %v598_v58  ;;  %v3391_v58 = vadd.f32 %v3008_v63, %v2748_v37 }
 0x1b4   :  { %v2362_v20 = vpop.eup %2361  ;;  %v2059_v55 = vpack.c.bf16 %v1487_v44, %v1486_v2  ;;  %v1450_v38 = vmul.f32 %v3191_v47, %v1382_v53  ;;  %818 = vadd.xlane.f32.xlu1 %v729_v26 }
 0x1b5   :  { %v2364_v46 = vpop.eup %2363  ;;  %v1519_v17 = vadd.f32 %v3204_v1, %v1451_v32  ;;  %v1349_v8 = vmul.f32 %v2362_v20, %v1157_v52  ;;  %816 = vadd.xlane.f32.xlu0 %v728_v50  ;;  %v594_v51 = vpop.xlane.xlu1 %593  ;;  %v3383_v32 = vmul.f32 0.0078125, %v3327_v22  ;;  %v3387_v50 = vadd.f32 %v2984_v57, %v2748_v37 }
 0x1b6   :  { %v3356_v48 = vpop.xlane.xlu0 %591  ;;  %2203 = vst [vmem:[#allocation2 + $0x18] sm:$0xff] %v2059_v55   ;;  %v1518_v45 = vadd.f32 %v3204_v1, %v1450_v38  ;;  %v1348_v39 = vmul.f32 %v2364_v46, %v1156_v21  ;;  %v1003_v22 = vmul.f32 %v3378_v6, %v3378_v6  ;;  %v3400_v57 = vmul.f32 0.0078125, %v528_v33 }
 0x1b7   :  { %v1417_v62 = vmul.f32 %v3191_v47, %v1349_v8 }
 0x1b8   :  { %v2366_v25 = vpop.eup %2365  ;;  %v2139_v24 = vpack.c.bf16 %v1519_v17, %v1518_v45  ;;  %v1416_v41 = vmul.f32 %v3191_v47, %v1348_v39  ;;  %882 = vadd.xlane.f32.xlu1 %v761_v0  ;;  %v3398_v17 = vmul.f32 0.0078125, %v530_v59  ;;  %v3893_v59 = vld [vmem:[#allocation15_spill] sm:$0xff] }
 0x1b9   :  { %v2368_v54 = vpop.eup %2367  ;;  %v1485_v16 = vadd.f32 %v3204_v1, %v1417_v62  ;;  %v1381_v4 = vmul.f32 %v2366_v25, %v1189_v35  ;;  %880 = vadd.xlane.f32.xlu0 %v760_v12  ;;  %v791_v44 = vpop.xlane.xlu1 %790  ;;  %v1002_v62 = vmul.f32 %v3383_v32, %v3383_v32  ;;  %v3408_v12 = vadd.f32 %v2994_v9, %v2748_v37 }
 0x1ba   :  { %v789_v5 = vpop.xlane.xlu0 %788  ;;  %2219 = vst [vmem:[#allocation2 + $0x98] sm:$0xff] %v2139_v24   ;;  %v1484_v18 = vadd.f32 %v3204_v1, %v1416_v41  ;;  %v1380_v2 = vmul.f32 %v2368_v54, %v1188_v11  ;;  %v907_v53 = vmul.f32 0.0078125, %v791_v44  ;;  %v3412_v33 = vadd.f32 %v3893_v59, %v2748_v37 }
 0x1bb   :  { %v906_v26 = vmul.f32 0.0078125, %v789_v5  ;;  %v1449_v52 = vmul.f32 %v3191_v47, %v1381_v4  ;;  %v968_v54 = vmul.f32 %v3400_v57, %v3400_v57 }
 0x1bc   :  { %v2054_v20 = vpack.c.bf16 %v1485_v16, %v1484_v18  ;;  %v1448_v21 = vmul.f32 %v3191_v47, %v1380_v2  ;;  %v1035_v55 = vsub.f32 %v907_v53, %v971_v40  ;;  %573 = vadd.xlane.f32.xlu1 %v3366_v34  ;;  %v969_v40 = vmul.f32 %v3398_v17, %v3398_v17  ;;  %v3894_v2 = vld [vmem:[#allocation14_spill] sm:$0xff] }
 0x1bd   :  { %v1034_v38 = vsub.f32 %v906_v26, %v970_v3  ;;  %v1517_v46 = vadd.f32 %v3204_v1, %v1449_v52  ;;  %571 = vadd.xlane.f32.xlu0 %v3387_v50  ;;  %v855_v63 = vpop.xlane.xlu1 %854  ;;  %v3419_v16 = vmul.f32 0.0078125, %v594_v51  ;;  %v3424_v53 = vadd.f32 %v3894_v2, %v2748_v37 }
 0x1be   :  { %v853_v8 = vpop.xlane.xlu0 %852  ;;  %2202 = vst [vmem:[#allocation2 + $0x10] sm:$0xff] %v2054_v20   ;;  %v1516_v45 = vadd.f32 %v3204_v1, %v1448_v21  ;;  %v1099_v39 = vmax.f32 %v1035_v55, 0.0  ;;  %v939_v35 = vmul.f32 0.0078125, %v855_v63  ;;  %v3427_v26 = vmul.f32 0.0078125, %v3356_v48 }
 0x1bf   :  { %v1098_v0 = vmax.f32 %v1034_v38, 0.0  ;;  %v938_v25 = vmul.f32 0.0078125, %v853_v8  ;;  %v1001_v55 = vmul.f32 %v3419_v16, %v3419_v16  ;;  %v3895_v38 = vld [vmem:[#allocation19_spill] sm:$0xff] }
 0x1c0   :  { %v2134_v14 = vpack.c.bf16 %v1517_v46, %v1516_v45  ;;  %v1227_v11 = vadd.f32 1e-05, %v1099_v39  ;;  %v1067_v41 = vsub.f32 %v939_v35, %v1003_v22  ;;  %637 = vadd.xlane.f32.xlu1 %v3391_v58  ;;  %v3434_v46 = vadd.f32 %v3895_v38, %v2748_v37  ;;  %v3896_v35 = vld [vmem:[#allocation18_spill] sm:$0xff] }
 0x1c1   :  { %v1226_v24 = vadd.f32 1e-05, %v1098_v0  ;;  %v1066_v9 = vsub.f32 %v938_v25, %v1002_v62  ;;  %635 = vadd.xlane.f32.xlu0 %v3412_v33  ;;  %v787_v4 = vpop.xlane.xlu1 %786  ;;  %v1000_v0 = vmul.f32 %v3427_v26, %v3427_v26  ;;  %v3441_v62 = vadd.f32 %v3896_v35, %v2748_v37  ;;  %v3897_v37 = vld [vmem:[#allocation7_spill] sm:$0xff] }
 0x1c2   :  { %v785_v3 = vpop.xlane.xlu0 %784  ;;  %2218 = vst [vmem:[#allocation2 + $0x90] sm:$0xff] %v2134_v14   ;;  %2369 = vrsqrt.f32 %v1227_v11  ;;  %v1131_v44 = vmax.f32 %v1067_v41, 0.0  ;;  %v905_v5 = vmul.f32 0.0078125, %v787_v4  ;;  %v1163_v4 = vsub.f32 %v3897_v37, %v3351_v13  ;;  %v3901_v37 = vld [vmem:[#allocation11_spill] sm:$0xff] }
 0x1c3   :  { %v904_v18 = vmul.f32 0.0078125, %v785_v3  ;;  %2371 = vrsqrt.f32 %v1226_v24  ;;  %v1130_v51 = vmax.f32 %v1066_v9, 0.0  ;;  %v735_v9 = vmul.f32 %v3366_v34, %v3366_v34 }
 0x1c4   :  { %v1259_v52 = vadd.f32 1e-05, %v1131_v44  ;;  %v1033_v20 = vsub.f32 %v905_v5, %v969_v40  ;;  %569 = vadd.xlane.f32.xlu1 %v3408_v12  ;;  %v734_v44 = vmul.f32 %v3387_v50, %v3387_v50  ;;  %v733_v13 = vmul.f32 %v3408_v12, %v3408_v12 }
 0x1c5   :  { %v1032_v21 = vsub.f32 %v904_v18, %v968_v54  ;;  %v1258_v22 = vadd.f32 1e-05, %v1130_v51  ;;  %567 = vadd.xlane.f32.xlu0 %v3424_v53  ;;  %v851_v63 = vpop.xlane.xlu1 %850  ;;  %v3898_v18 = vld [vmem:[#allocation6_spill] sm:$0xff] }
 0x1c6   :  { %v849_v48 = vpop.xlane.xlu0 %848  ;;  %2373 = vrsqrt.f32 %v1259_v52  ;;  %v1097_v8 = vmax.f32 %v1033_v20, 0.0  ;;  %v937_v39 = vmul.f32 0.0078125, %v851_v63  ;;  %v1162_v2 = vsub.f32 %v3898_v18, %v3354_v42  ;;  %v3899_v63 = vld [vmem:[#allocation9_spill] sm:$0xff] }
 0x1c7   :  { %v1096_v45 = vmax.f32 %v1032_v21, 0.0  ;;  %2375 = vrsqrt.f32 %v1258_v22  ;;  %v936_v59 = vmul.f32 0.0078125, %v849_v48  ;;  %v1195_v48 = vsub.f32 %v3899_v63, %v3378_v6 }
 0x1c8   :  { %v1225_v25 = vadd.f32 1e-05, %v1097_v8  ;;  %v1065_v11 = vsub.f32 %v937_v39, %v1001_v55  ;;  %633 = vadd.xlane.f32.xlu1 %v3434_v46  ;;  %v732_v42 = vmul.f32 %v3424_v53, %v3424_v53  ;;  %v3900_v39 = vld [vmem:[#allocation8_spill] sm:$0xff] }
 0x1c9   :  { %v1224_v14 = vadd.f32 1e-05, %v1096_v45  ;;  %v1064_v24 = vsub.f32 %v936_v59, %v1000_v0  ;;  %631 = vadd.xlane.f32.xlu0 %v3441_v62  ;;  %v542_v41 = vpop.xlane.xlu1 %541  ;;  %v1194_v0 = vsub.f32 %v3900_v39, %v3383_v32  ;;  %v766_v39 = vmul.f32 %v3412_v33, %v3412_v33 }
 0x1ca   :  { %v540_v40 = vpop.xlane.xlu0 %539  ;;  %2377 = vrsqrt.f32 %v1225_v25  ;;  %v1129_v54 = vmax.f32 %v1065_v11, 0.0 }
 0x1cb   :  { %2379 = vrsqrt.f32 %v1224_v14  ;;  %v1128_v3 = vmax.f32 %v1064_v24, 0.0 }
 0x1cc   :  { %v2370_v5 = vpop.eup %2369  ;;  %v1257_v51 = vadd.f32 1e-05, %v1129_v54  ;;  %830 = vadd.xlane.f32.xlu1 %v735_v9  ;;  %v765_v9 = vmul.f32 %v3434_v46, %v3434_v46 }
 0x1cd   :  { %v2372_v52 = vpop.eup %2371  ;;  %v1355_v20 = vmul.f32 %v2370_v5, %v1163_v4  ;;  %v1256_v21 = vadd.f32 1e-05, %v1128_v3  ;;  %828 = vadd.xlane.f32.xlu0 %v734_v44  ;;  %v606_v55 = vpop.xlane.xlu1 %605  ;;  %v1161_v4 = vsub.f32 %v3901_v37, %v3398_v17  ;;  %v764_v3 = vmul.f32 %v3441_v62, %v3441_v62  ;;  %v3902_v5 = vld [vmem:[#allocation10_spill] sm:$0xff] }
 0x1ce   :  { %v3453_v38 = vpop.xlane.xlu0 %603  ;;  %v1354_v22 = vmul.f32 %v2372_v52, %v1162_v2  ;;  %2381 = vrsqrt.f32 %v1257_v51  ;;  %v1160_v18 = vsub.f32 %v3902_v5, %v3400_v57  ;;  %v3477_v52 = vmul.f32 0.0078125, %v542_v41  ;;  %v3903_v41 = vld [vmem:[#allocation13_spill] sm:$0xff] }
 0x1cf   :  { %v1423_v8 = vmul.f32 %v3191_v47, %v1355_v20  ;;  %2383 = vrsqrt.f32 %v1256_v21  ;;  %v3480_v17 = vmul.f32 0.0078125, %v540_v40  ;;  %v767_v57 = vmul.f32 %v3391_v58, %v3391_v58 }
 0x1d0   :  { %v2374_v45 = vpop.eup %2373  ;;  %v1422_v35 = vmul.f32 %v3191_v47, %v1354_v22  ;;  %826 = vadd.xlane.f32.xlu1 %v733_v13  ;;  %v3498_v37 = vmul.f32 0.0078125, %v606_v55 }
 0x1d1   :  { %v2376_v59 = vpop.eup %2375  ;;  %v1491_v25 = vadd.f32 %v3204_v1, %v1423_v8  ;;  %v1387_v14 = vmul.f32 %v2374_v45, %v1195_v48  ;;  %824 = vadd.xlane.f32.xlu0 %v732_v42  ;;  %v538_v11 = vpop.xlane.xlu1 %537  ;;  %v1193_v42 = vsub.f32 %v3903_v41, %v3419_v16 }
 0x1d2   :  { %v536_v6 = vpop.xlane.xlu0 %535  ;;  %v1490_v24 = vadd.f32 %v3204_v1, %v1422_v35  ;;  %v1386_v54 = vmul.f32 %v2376_v59, %v1194_v0  ;;  %v3904_v0 = vld [vmem:[#allocation12_spill] sm:$0xff] }
 0x1d3   :  { %v1455_v32 = vmul.f32 %v3191_v47, %v1387_v14  ;;  %v1192_v35 = vsub.f32 %v3904_v0, %v3427_v26  ;;  %v975_v14 = vmul.f32 %v3477_v52, %v3477_v52 }
 0x1d4   :  { %v2378_v44 = vpop.eup %2377  ;;  %v2069_v2 = vpack.c.bf16 %v1491_v25, %v1490_v24  ;;  %v1454_v51 = vmul.f32 %v3191_v47, %v1386_v54  ;;  %890 = vadd.xlane.f32.xlu1 %v765_v9  ;;  %v974_v9 = vmul.f32 %v3480_v17, %v3480_v17 }
 0x1d5   :  { %v2380_v20 = vpop.eup %2379  ;;  %v1523_v21 = vadd.f32 %v3204_v1, %v1455_v32  ;;  %v1353_v22 = vmul.f32 %v2378_v44, %v1161_v4  ;;  %888 = vadd.xlane.f32.xlu0 %v764_v3  ;;  %v602_v13 = vpop.xlane.xlu1 %601 }
 0x1d6   :  { %v600_v63 = vpop.xlane.xlu0 %599  ;;  %2205 = vst [vmem:[#allocation2 + $0x28] sm:$0xff] %v2069_v2   ;;  %v1522_v48 = vadd.f32 %v3204_v1, %v1454_v51  ;;  %v1352_v8 = vmul.f32 %v2380_v20, %v1160_v18  ;;  %v3503_v2 = vmul.f32 0.0078125, %v3453_v38 }
 0x1d7   :  { %v1421_v45 = vmul.f32 %v3191_v47, %v1353_v22 }
 0x1d8   :  { %v2382_v40 = vpop.eup %2381  ;;  %v2149_v59 = vpack.c.bf16 %v1523_v21, %v1522_v48  ;;  %v1420_v25 = vmul.f32 %v3191_v47, %v1352_v8  ;;  %894 = vadd.xlane.f32.xlu1 %v767_v57  ;;  %v1007_v48 = vmul.f32 %v3498_v37, %v3498_v37  ;;  %v3509_v8 = vmul.f32 0.0078125, %v538_v11 }
 0x1d9   :  { %v2384_v24 = vpop.eup %2383  ;;  %v1489_v54 = vadd.f32 %v3204_v1, %v1421_v45  ;;  %v1385_v16 = vmul.f32 %v2382_v40, %v1193_v42  ;;  %892 = vadd.xlane.f32.xlu0 %v766_v39  ;;  %v799_v4 = vpop.xlane.xlu1 %798  ;;  %v3511_v57 = vmul.f32 0.0078125, %v536_v6  ;;  %v1006_v0 = vmul.f32 %v3503_v2, %v3503_v2 }
 0x1da   :  { %v797_v32 = vpop.xlane.xlu0 %796  ;;  %2221 = vst [vmem:[#allocation2 + $0xa8] sm:$0xff] %v2149_v59   ;;  %v1488_v26 = vadd.f32 %v3204_v1, %v1420_v25  ;;  %v1384_v3 = vmul.f32 %v2384_v24, %v1192_v35  ;;  %v911_v44 = vmul.f32 0.0078125, %v799_v4  ;;  %v973_v11 = vmul.f32 %v3509_v8, %v3509_v8 }
 0x1db   :  { %v910_v5 = vmul.f32 0.0078125, %v797_v32  ;;  %v1453_v18 = vmul.f32 %v3191_v47, %v1385_v16  ;;  %v972_v6 = vmul.f32 %v3511_v57, %v3511_v57 }
 0x1dc   :  { %v2064_v51 = vpack.c.bf16 %v1489_v54, %v1488_v26  ;;  %v1452_v20 = vmul.f32 %v3191_v47, %v1384_v3  ;;  %v1039_v21 = vsub.f32 %v911_v44, %v975_v14  ;;  %v3520_v54 = vmul.f32 0.0078125, %v602_v13 }
 0x1dd   :  { %v1038_v55 = vsub.f32 %v910_v5, %v974_v9  ;;  %v1521_v22 = vadd.f32 %v3204_v1, %v1453_v18  ;;  %v863_v41 = vpop.xlane.xlu1 %862  ;;  %v3522_v44 = vmul.f32 0.0078125, %v600_v63 }
 0x1de   :  { %v861_v42 = vpop.xlane.xlu0 %860  ;;  %2204 = vst [vmem:[#allocation2 + $0x20] sm:$0xff] %v2064_v51   ;;  %v1520_v38 = vadd.f32 %v3204_v1, %v1452_v20  ;;  %v1103_v45 = vmax.f32 %v1039_v21, 0.0  ;;  %v943_v40 = vmul.f32 0.0078125, %v863_v41  ;;  %v1005_v21 = vmul.f32 %v3520_v54, %v3520_v54 }
 0x1df   :  { %v1102_v39 = vmax.f32 %v1038_v55, 0.0  ;;  %v942_v35 = vmul.f32 0.0078125, %v861_v42 }
 0x1e0   :  { %v2144_v59 = vpack.c.bf16 %v1521_v22, %v1520_v38  ;;  %v1231_v25 = vadd.f32 1e-05, %v1103_v45  ;;  %v1071_v24 = vsub.f32 %v943_v40, %v1007_v48  ;;  %v1004_v38 = vmul.f32 %v3522_v44, %v3522_v44 }
 0x1e1   :  { %v1230_v14 = vadd.f32 1e-05, %v1102_v39  ;;  %v1070_v16 = vsub.f32 %v942_v35, %v1006_v0  ;;  %v795_v9 = vpop.xlane.xlu1 %794 }
 0x1e2   :  { %v793_v4 = vpop.xlane.xlu0 %792  ;;  %2220 = vst [vmem:[#allocation2 + $0xa0] sm:$0xff] %v2144_v59   ;;  %2385 = vrsqrt.f32 %v1231_v25  ;;  %v1135_v32 = vmax.f32 %v1071_v24, 0.0  ;;  %v909_v26 = vmul.f32 0.0078125, %v795_v9 }
 0x1e3   :  { %v908_v3 = vmul.f32 0.0078125, %v793_v4  ;;  %2387 = vrsqrt.f32 %v1230_v14  ;;  %v1134_v5 = vmax.f32 %v1070_v16, 0.0  ;;  %v3905_v14 = vld [vmem:[#allocation17_spill] sm:$0xff]  ;;  %v3906_v16 = vld [vmem:[#allocation16_spill] sm:$0xff] }
 0x1e4   :  { %v1263_v18 = vadd.f32 1e-05, %v1135_v32  ;;  %v1037_v51 = vsub.f32 %v909_v26, %v973_v11  ;;  %v1167_v24 = vsub.f32 %v3905_v14, %v3477_v52  ;;  %v1166_v9 = vsub.f32 %v3906_v16, %v3480_v17  ;;  %v3910_v14 = vld [vmem:[#allocation22_spill] sm:$0xff] }
 0x1e5   :  { %v1036_v20 = vsub.f32 %v908_v3, %v972_v6  ;;  %v1262_v13 = vadd.f32 1e-05, %v1134_v5  ;;  %v859_v55 = vpop.xlane.xlu1 %858 }
 0x1e6   :  { %v857_v22 = vpop.xlane.xlu0 %856  ;;  %2389 = vrsqrt.f32 %v1263_v18  ;;  %v1101_v48 = vmax.f32 %v1037_v51, 0.0  ;;  %v941_v42 = vmul.f32 0.0078125, %v859_v55  ;;  %v3908_v55 = vld [vmem:[#allocation20_spill] sm:$0xff] }
 0x1e7   :  { %v1100_v41 = vmax.f32 %v1036_v20, 0.0  ;;  %2391 = vrsqrt.f32 %v1262_v13  ;;  %v940_v63 = vmul.f32 0.0078125, %v857_v22  ;;  %v3907_v20 = vld [vmem:[#allocation21_spill] sm:$0xff]  ;;  %v1198_v22 = vsub.f32 %v3908_v55, %v3503_v2 }
 0x1e8   :  { %v1229_v45 = vadd.f32 1e-05, %v1101_v48  ;;  %v1069_v40 = vsub.f32 %v941_v42, %v1005_v21  ;;  %v1199_v21 = vsub.f32 %v3907_v20, %v3498_v37  ;;  %v3909_v37 = vld [vmem:[#allocation23_spill] sm:$0xff]  ;;  %v1164_v2 = vsub.f32 %v3910_v14, %v3511_v57 }
 0x1e9   :  { %v1228_v39 = vadd.f32 1e-05, %v1100_v41  ;;  %v1068_v0 = vsub.f32 %v940_v63, %v1004_v38  ;;  %v550_v35 = vpop.xlane.xlu1 %549 }
 0x1ea   :  { %v548_v59 = vpop.xlane.xlu0 %547  ;;  %2393 = vrsqrt.f32 %v1229_v45  ;;  %v1133_v25 = vmax.f32 %v1069_v40, 0.0  ;;  %v1165_v40 = vsub.f32 %v3909_v37, %v3509_v8 }
 0x1eb   :  { %2395 = vrsqrt.f32 %v1228_v39  ;;  %v1132_v11 = vmax.f32 %v1068_v0, 0.0 }
 0x1ec   :  { %v2386_v6 = vpop.eup %2385  ;;  %v1261_v4 = vadd.f32 1e-05, %v1133_v25 }
 0x1ed   :  { %v2388_v32 = vpop.eup %2387  ;;  %v1359_v26 = vmul.f32 %v2386_v6, %v1167_v24  ;;  %v1260_v3 = vadd.f32 1e-05, %v1132_v11  ;;  %v614_v5 = vpop.xlane.xlu1 %613 }
 0x1ee   :  { %v612_v18 = vpop.xlane.xlu0 %611  ;;  %v1358_v51 = vmul.f32 %v2388_v32, %v1166_v9  ;;  %2397 = vrsqrt.f32 %v1261_v4  ;;  %v3547_v4 = vmul.f32 0.0078125, %v550_v35 }
 0x1ef   :  { %v1427_v13 = vmul.f32 %v3191_v47, %v1359_v26  ;;  %2399 = vrsqrt.f32 %v1260_v3 }
 0x1f0   :  { %v2390_v52 = vpop.eup %2389  ;;  %v1426_v17 = vmul.f32 %v3191_v47, %v1358_v51  ;;  %v3911_v51 = vld [vmem:[#allocation25_spill] sm:$0xff] }
 0x1f1   :  { %v2392_v48 = vpop.eup %2391  ;;  %v1495_v41 = vadd.f32 %v3204_v1, %v1427_v13  ;;  %v1391_v42 = vmul.f32 %v2390_v52, %v1199_v21  ;;  %v546_v38 = vpop.xlane.xlu1 %545  ;;  %v1197_v20 = vsub.f32 %v3911_v51, %v3520_v54  ;;  %v3553_v21 = vmul.f32 0.0078125, %v548_v59  ;;  %v3912_v52 = vld [vmem:[#allocation24_spill] sm:$0xff] }
 0x1f2   :  { %v544_v63 = vpop.xlane.xlu0 %543  ;;  %v1494_v45 = vadd.f32 %v3204_v1, %v1426_v17  ;;  %v1390_v39 = vmul.f32 %v2392_v48, %v1198_v22  ;;  %v1196_v55 = vsub.f32 %v3912_v52, %v3522_v44 }
 0x1f3   :  { %v1459_v0 = vmul.f32 %v3191_v47, %v1391_v42  ;;  %v979_v42 = vmul.f32 %v3547_v4, %v3547_v4 }
 0x1f4   :  { %v2394_v25 = vpop.eup %2393  ;;  %v2079_v24 = vpack.c.bf16 %v1495_v41, %v1494_v45  ;;  %v1458_v11 = vmul.f32 %v3191_v47, %v1390_v39  ;;  %v3562_v39 = vmul.f32 0.0078125, %v614_v5  ;;  %v3573_v5 = vmul.f32 0.0078125, %v544_v63 }
 0x1f5   :  { %v2396_v6 = vpop.eup %2395  ;;  %v1527_v16 = vadd.f32 %v3204_v1, %v1459_v0  ;;  %v1357_v9 = vmul.f32 %v2394_v25, %v1165_v40  ;;  %v610_v32 = vpop.xlane.xlu1 %609  ;;  %v978_v0 = vmul.f32 %v3553_v21, %v3553_v21  ;;  %v3567_v25 = vmul.f32 0.0078125, %v612_v18 }
 0x1f6   :  { %v608_v26 = vpop.xlane.xlu0 %607  ;;  %2207 = vst [vmem:[#allocation2 + $0x38] sm:$0xff] %v2079_v24   ;;  %v1526_v8 = vadd.f32 %v3204_v1, %v1458_v11  ;;  %v1356_v3 = vmul.f32 %v2396_v6, %v1164_v2  ;;  %v1011_v18 = vmul.f32 %v3562_v39, %v3562_v39 }
 0x1f7   :  { %v1425_v57 = vmul.f32 %v3191_v47, %v1357_v9 }
 0x1f8   :  { %v2398_v13 = vpop.eup %2397  ;;  %v2159_v22 = vpack.c.bf16 %v1527_v16, %v1526_v8  ;;  %v1424_v35 = vmul.f32 %v3191_v47, %v1356_v3  ;;  %v3571_v16 = vmul.f32 0.0078125, %v546_v38 }
 0x1f9   :  { %v2400_v17 = vpop.eup %2399  ;;  %v1493_v48 = vadd.f32 %v3204_v1, %v1425_v57  ;;  %v1389_v41 = vmul.f32 %v2398_v13, %v1197_v20  ;;  %v807_v45 = vpop.xlane.xlu1 %806  ;;  %v1010_v13 = vmul.f32 %v3567_v25, %v3567_v25 }
 0x1fa   :  { %2223 = vst [vmem:[#allocation2 + $0xb8] sm:$0xff] %v2159_v22   ;;  %v1492_v54 = vadd.f32 %v3204_v1, %v1424_v35  ;;  %v1388_v59 = vmul.f32 %v2400_v17, %v1196_v55  ;;  %v915_v37 = vmul.f32 0.0078125, %v807_v45  ;;  %v805_v40 = vpop.xlane.xlu0 %804  ;;  %v977_v35 = vmul.f32 %v3571_v16, %v3571_v16 }
 0x1fb   :  { %v1457_v44 = vmul.f32 %v3191_v47, %v1389_v41  ;;  %v914_v14 = vmul.f32 0.0078125, %v805_v40  ;;  %v976_v17 = vmul.f32 %v3573_v5, %v3573_v5  ;;  %v3584_v45 = vmul.f32 0.0078125, %v610_v32 }
 0x1fc   :  { %v2074_v2 = vpack.c.bf16 %v1493_v48, %v1492_v54  ;;  %v1456_v24 = vmul.f32 %v3191_v47, %v1388_v59  ;;  %v1043_v11 = vsub.f32 %v915_v37, %v979_v42  ;;  %v3586_v40 = vmul.f32 0.0078125, %v608_v26 }
 0x1fd   :  { %v1525_v6 = vadd.f32 %v3204_v1, %v1457_v44  ;;  %v1042_v9 = vsub.f32 %v914_v14, %v978_v0  ;;  %v871_v8 = vpop.xlane.xlu1 %870 }
 0x1fe   :  { %2206 = vst [vmem:[#allocation2 + $0x30] sm:$0xff] %v2074_v2   ;;  %v1524_v3 = vadd.f32 %v3204_v1, %v1456_v24  ;;  %v1107_v51 = vmax.f32 %v1043_v11, 0.0  ;;  %v947_v20 = vmul.f32 0.0078125, %v871_v8  ;;  %v869_v57 = vpop.xlane.xlu0 %868 }
 0x1ff   :  { %v1106_v52 = vmax.f32 %v1042_v9, 0.0  ;;  %v946_v55 = vmul.f32 0.0078125, %v869_v57  ;;  %v1009_v9 = vmul.f32 %v3584_v45, %v3584_v45 }
 0x200   :  { %v2154_v38 = vpack.c.bf16 %v1525_v6, %v1524_v3  ;;  %v1235_v22 = vadd.f32 1e-05, %v1107_v51  ;;  %v1075_v63 = vsub.f32 %v947_v20, %v1011_v18  ;;  %v1008_v18 = vmul.f32 %v3586_v40, %v3586_v40 }
 0x201   :  { %v1234_v48 = vadd.f32 1e-05, %v1106_v52  ;;  %v1074_v41 = vsub.f32 %v946_v55, %v1010_v13  ;;  %v803_v42 = vpop.xlane.xlu1 %802 }
 0x202   :  { %2222 = vst [vmem:[#allocation2 + $0xb0] sm:$0xff] %v2154_v38   ;;  %2401 = vrsqrt.f32 %v1235_v22  ;;  %v1139_v54 = vmax.f32 %v1075_v63, 0.0  ;;  %v913_v59 = vmul.f32 0.0078125, %v803_v42  ;;  %v801_v37 = vpop.xlane.xlu0 %800  ;;  %v3913_v63 = vld [vmem:[#allocation27_spill] sm:$0xff] }
 0x203   :  { %2403 = vrsqrt.f32 %v1234_v48  ;;  %v1138_v44 = vmax.f32 %v1074_v41, 0.0  ;;  %v912_v0 = vmul.f32 0.0078125, %v801_v37  ;;  %v3914_v41 = vld [vmem:[#allocation26_spill] sm:$0xff] }
 0x204   :  { %v1267_v14 = vadd.f32 1e-05, %v1139_v54  ;;  %v1041_v2 = vsub.f32 %v913_v59, %v977_v35  ;;  %v1171_v35 = vsub.f32 %v3913_v63, %v3547_v4  ;;  %v1170_v42 = vsub.f32 %v3914_v41, %v3553_v21  ;;  %v3918_v63 = vld [vmem:[#allocation30_spill] sm:$0xff] }
 0x205   :  { %v1266_v24 = vadd.f32 1e-05, %v1138_v44  ;;  %v1040_v11 = vsub.f32 %v912_v0, %v976_v17  ;;  %v867_v6 = vpop.xlane.xlu1 %866 }
 0x206   :  { %2405 = vrsqrt.f32 %v1267_v14  ;;  %v1105_v32 = vmax.f32 %v1041_v2, 0.0  ;;  %v945_v8 = vmul.f32 0.0078125, %v867_v6  ;;  %v865_v3 = vpop.xlane.xlu0 %864 }
 0x207   :  { %2407 = vrsqrt.f32 %v1266_v24  ;;  %v1104_v26 = vmax.f32 %v1040_v11, 0.0  ;;  %v944_v51 = vmul.f32 0.0078125, %v865_v3  ;;  %v3915_v24 = vld [vmem:[#allocation29_spill] sm:$0xff] }
 0x208   :  { %v1233_v20 = vadd.f32 1e-05, %v1105_v32  ;;  %v1073_v57 = vsub.f32 %v945_v8, %v1009_v9  ;;  %v1203_v11 = vsub.f32 %v3915_v24, %v3562_v39  ;;  %v3916_v9 = vld [vmem:[#allocation28_spill] sm:$0xff]  ;;  %v3917_v39 = vld [vmem:[#allocation31_spill] sm:$0xff] }
 0x209   :  { %v1232_v13 = vadd.f32 1e-05, %v1104_v26  ;;  %v1072_v52 = vsub.f32 %v944_v51, %v1008_v18  ;;  %v558_v55 = vpop.xlane.xlu1 %557  ;;  %v1202_v32 = vsub.f32 %v3916_v9, %v3567_v25  ;;  %v1168_v25 = vsub.f32 %v3918_v63, %v3573_v5 }
 0x20a   :  { %2409 = vrsqrt.f32 %v1233_v20  ;;  %v1137_v38 = vmax.f32 %v1073_v57, 0.0  ;;  %v556_v22 = vpop.xlane.xlu0 %555 }
 0x20b   :  { %2411 = vrsqrt.f32 %v1232_v13  ;;  %v1136_v17 = vmax.f32 %v1072_v52, 0.0  ;;  %v1169_v13 = vsub.f32 %v3917_v39, %v3571_v16 }
 0x20c   :  { %v2402_v48 = vpop.eup %2401  ;;  %v1265_v54 = vadd.f32 1e-05, %v1137_v38 }
 0x20d   :  { %v2404_v59 = vpop.eup %2403  ;;  %v1363_v37 = vmul.f32 %v2402_v48, %v1171_v35  ;;  %v1264_v44 = vadd.f32 1e-05, %v1136_v17  ;;  %v622_v0 = vpop.xlane.xlu1 %621 }
 0x20e   :  { %v1362_v14 = vmul.f32 %v2404_v59, %v1170_v42  ;;  %2413 = vrsqrt.f32 %v1265_v54  ;;  %v620_v2 = vpop.xlane.xlu0 %619  ;;  %v3611_v54 = vmul.f32 0.0078125, %v558_v55 }
 0x20f   :  { %v1431_v6 = vmul.f32 %v3191_v47, %v1363_v37  ;;  %2415 = vrsqrt.f32 %v1264_v44 }
 0x210   :  { %v2406_v4 = vpop.eup %2405  ;;  %v1430_v21 = vmul.f32 %v3191_v47, %v1362_v14  ;;  %v3919_v14 = vld [vmem:[#allocation33_spill] sm:$0xff] }
 0x211   :  { %v2408_v8 = vpop.eup %2407  ;;  %v1499_v3 = vadd.f32 %v3204_v1, %v1431_v6  ;;  %v1395_v18 = vmul.f32 %v2406_v4, %v1203_v11  ;;  %v554_v26 = vpop.xlane.xlu1 %553  ;;  %v1201_v24 = vsub.f32 %v3919_v14, %v3584_v45  ;;  %v3617_v11 = vmul.f32 0.0078125, %v556_v22  ;;  %v3920_v4 = vld [vmem:[#allocation32_spill] sm:$0xff] }
 0x212   :  { %v1498_v51 = vadd.f32 %v3204_v1, %v1430_v21  ;;  %v1394_v20 = vmul.f32 %v2408_v8, %v1202_v32  ;;  %v552_v57 = vpop.xlane.xlu0 %551  ;;  %v1200_v9 = vsub.f32 %v3920_v4, %v3586_v40 }
 0x213   :  { %v1463_v52 = vmul.f32 %v3191_v47, %v1395_v18  ;;  %v983_v18 = vmul.f32 %v3611_v54, %v3611_v54 }
 0x214   :  { %v2410_v38 = vpop.eup %2409  ;;  %v2089_v35 = vpack.c.bf16 %v1499_v3, %v1498_v51  ;;  %v1462_v17 = vmul.f32 %v3191_v47, %v1394_v20  ;;  %v3626_v20 = vmul.f32 0.0078125, %v622_v0  ;;  %v3637_v0 = vmul.f32 0.0078125, %v552_v57 }
 0x215   :  { %v2412_v48 = vpop.eup %2411  ;;  %v1531_v41 = vadd.f32 %v3204_v1, %v1463_v52  ;;  %v1361_v42 = vmul.f32 %v2410_v38, %v1169_v13  ;;  %v618_v59 = vpop.xlane.xlu1 %617  ;;  %v982_v52 = vmul.f32 %v3617_v11, %v3617_v11  ;;  %v3631_v38 = vmul.f32 0.0078125, %v620_v2 }
 0x216   :  { %2209 = vst [vmem:[#allocation2 + $0x48] sm:$0xff] %v2089_v35   ;;  %v1530_v37 = vadd.f32 %v3204_v1, %v1462_v17  ;;  %v1360_v16 = vmul.f32 %v2412_v48, %v1168_v25  ;;  %v616_v44 = vpop.xlane.xlu0 %615  ;;  %v1015_v2 = vmul.f32 %v3626_v20, %v3626_v20 }
 0x217   :  { %v1429_v5 = vmul.f32 %v3191_v47, %v1361_v42 }
 0x218   :  { %v2414_v6 = vpop.eup %2413  ;;  %v2169_v32 = vpack.c.bf16 %v1531_v41, %v1530_v37  ;;  %v1428_v55 = vmul.f32 %v3191_v47, %v1360_v16  ;;  %v3635_v41 = vmul.f32 0.0078125, %v554_v26 }
 0x219   :  { %v2416_v21 = vpop.eup %2415  ;;  %v1497_v8 = vadd.f32 %v3204_v1, %v1429_v5  ;;  %v1393_v3 = vmul.f32 %v2414_v6, %v1201_v24  ;;  %v815_v51 = vpop.xlane.xlu1 %814  ;;  %v1014_v6 = vmul.f32 %v3631_v38, %v3631_v38 }
 0x21a   :  { %2225 = vst [vmem:[#allocation2 + $0xc8] sm:$0xff] %v2169_v32   ;;  %v1496_v45 = vadd.f32 %v3204_v1, %v1428_v55  ;;  %v1392_v22 = vmul.f32 %v2416_v21, %v1200_v9  ;;  %v919_v39 = vmul.f32 0.0078125, %v815_v51  ;;  %v813_v13 = vpop.xlane.xlu0 %812  ;;  %v981_v55 = vmul.f32 %v3635_v41, %v3635_v41 }
 0x21b   :  { %v1461_v40 = vmul.f32 %v3191_v47, %v1393_v3  ;;  %v918_v63 = vmul.f32 0.0078125, %v813_v13  ;;  %v980_v21 = vmul.f32 %v3637_v0, %v3637_v0  ;;  %v3648_v51 = vmul.f32 0.0078125, %v618_v59 }
 0x21c   :  { %v2084_v25 = vpack.c.bf16 %v1497_v8, %v1496_v45  ;;  %v1460_v35 = vmul.f32 %v3191_v47, %v1392_v22  ;;  %v1047_v17 = vsub.f32 %v919_v39, %v983_v18  ;;  %v3650_v13 = vmul.f32 0.0078125, %v616_v44 }
 0x21d   :  { %v1529_v48 = vadd.f32 %v3204_v1, %v1461_v40  ;;  %v1046_v42 = vsub.f32 %v918_v63, %v982_v52  ;;  %v879_v37 = vpop.xlane.xlu1 %878 }
 0x21e   :  { %2208 = vst [vmem:[#allocation2 + $0x40] sm:$0xff] %v2084_v25   ;;  %v1528_v16 = vadd.f32 %v3204_v1, %v1460_v35  ;;  %v1111_v14 = vmax.f32 %v1047_v17, 0.0  ;;  %v951_v24 = vmul.f32 0.0078125, %v879_v37  ;;  %v877_v5 = vpop.xlane.xlu0 %876 }
 0x21f   :  { %v1110_v4 = vmax.f32 %v1046_v42, 0.0  ;;  %v950_v9 = vmul.f32 0.0078125, %v877_v5  ;;  %v1013_v42 = vmul.f32 %v3648_v51, %v3648_v51 }
 0x220   :  { %v2164_v26 = vpack.c.bf16 %v1529_v48, %v1528_v16  ;;  %v1239_v32 = vadd.f32 1e-05, %v1111_v14  ;;  %v1079_v57 = vsub.f32 %v951_v24, %v1015_v2  ;;  %v1012_v2 = vmul.f32 %v3650_v13, %v3650_v13 }
 0x221   :  { %v1238_v8 = vadd.f32 1e-05, %v1110_v4  ;;  %v1078_v3 = vsub.f32 %v950_v9, %v1014_v6  ;;  %v811_v18 = vpop.xlane.xlu1 %810 }
 0x222   :  { %2224 = vst [vmem:[#allocation2 + $0xc0] sm:$0xff] %v2164_v26   ;;  %2417 = vrsqrt.f32 %v1239_v32  ;;  %v1143_v45 = vmax.f32 %v1079_v57, 0.0  ;;  %v917_v22 = vmul.f32 0.0078125, %v811_v18  ;;  %v809_v39 = vpop.xlane.xlu0 %808  ;;  %v1175_v57 = vsub.f32 %v3130_v30, %v3611_v54 }
 0x223   :  { %2419 = vrsqrt.f32 %v1238_v8  ;;  %v1142_v40 = vmax.f32 %v1078_v3, 0.0  ;;  %v916_v52 = vmul.f32 0.0078125, %v809_v39  ;;  %v1174_v8 = vsub.f32 %v3136_v56, %v3617_v11 }
 0x224   :  { %v1271_v63 = vadd.f32 1e-05, %v1143_v45  ;;  %v1045_v25 = vsub.f32 %v917_v22, %v981_v55  ;;  %v1206_v54 = vsub.f32 %v3150_v23, %v3631_v38  ;;  %v1172_v23 = vsub.f32 %v3170_v19, %v3637_v0 }
 0x225   :  { %v1270_v35 = vadd.f32 1e-05, %v1142_v40  ;;  %v1044_v17 = vsub.f32 %v916_v52, %v980_v21  ;;  %v875_v48 = vpop.xlane.xlu1 %874 }
 0x226   :  { %2421 = vrsqrt.f32 %v1271_v63  ;;  %v1109_v59 = vmax.f32 %v1045_v25, 0.0  ;;  %v949_v37 = vmul.f32 0.0078125, %v875_v48  ;;  %v873_v16 = vpop.xlane.xlu0 %872  ;;  %v1207_v63 = vsub.f32 %v3145_v7, %v3626_v20 }
 0x227   :  { %2423 = vrsqrt.f32 %v1270_v35  ;;  %v1108_v44 = vmax.f32 %v1044_v17, 0.0  ;;  %v948_v14 = vmul.f32 0.0078125, %v873_v16  ;;  %v1173_v7 = vsub.f32 %v3161_v31, %v3635_v41 }
 0x228   :  { %v1237_v24 = vadd.f32 1e-05, %v1109_v59  ;;  %v1077_v5 = vsub.f32 %v949_v37, %v1013_v42 }
 0x229   :  { %v1236_v6 = vadd.f32 1e-05, %v1108_v44  ;;  %v1076_v4 = vsub.f32 %v948_v14, %v1012_v2  ;;  %v566_v9 = vpop.xlane.xlu1 %565 }
 0x22a   :  { %2425 = vrsqrt.f32 %v1237_v24  ;;  %v1141_v26 = vmax.f32 %v1077_v5, 0.0  ;;  %v564_v32 = vpop.xlane.xlu0 %563  ;;  %v3675_v5 = vmul.f32 0.0078125, %v566_v9 }
 0x22b   :  { %2427 = vrsqrt.f32 %v1236_v6  ;;  %v1140_v55 = vmax.f32 %v1076_v4, 0.0  ;;  %v3681_v0 = vmul.f32 0.0078125, %v564_v32 }
 0x22c   :  { %v2418_v21 = vpop.eup %2417  ;;  %v1269_v3 = vadd.f32 1e-05, %v1141_v26  ;;  %v1205_v26 = vsub.f32 %v3178_v15, %v3648_v51 }
 0x22d   :  { %v2420_v18 = vpop.eup %2419  ;;  %v1367_v45 = vmul.f32 %v2418_v21, %v1175_v57  ;;  %v1268_v22 = vadd.f32 1e-05, %v1140_v55  ;;  %v630_v39 = vpop.xlane.xlu1 %629  ;;  %v1204_v55 = vsub.f32 %v3187_v28, %v3650_v13  ;;  %v986_v13 = vmul.f32 %v3681_v0, %v3681_v0 }
 0x22e   :  { %v1366_v40 = vmul.f32 %v2420_v18, %v1174_v8  ;;  %2429 = vrsqrt.f32 %v1269_v3  ;;  %v628_v52 = vpop.xlane.xlu0 %627  ;;  %v3690_v32 = vmul.f32 0.0078125, %v630_v39 }
 0x22f   :  { %v1435_v25 = vmul.f32 %v3191_v47, %v1367_v45  ;;  %2431 = vrsqrt.f32 %v1268_v22  ;;  %v987_v45 = vmul.f32 %v3675_v5, %v3675_v5 }
 0x230   :  { %v2422_v30 = vpop.eup %2421  ;;  %v1434_v56 = vmul.f32 %v3191_v47, %v1366_v40 }
 0x231   :  { %v2424_v11 = vpop.eup %2423  ;;  %v1503_v35 = vadd.f32 %v3204_v1, %v1435_v25  ;;  %v1399_v17 = vmul.f32 %v2422_v30, %v1207_v63  ;;  %v562_v48 = vpop.xlane.xlu1 %561  ;;  %v3695_v25 = vmul.f32 0.0078125, %v628_v52  ;;  %v1019_v52 = vmul.f32 %v3690_v32, %v3690_v32 }
 0x232   :  { %v1502_v42 = vadd.f32 %v3204_v1, %v1434_v56  ;;  %v1398_v59 = vmul.f32 %v2424_v11, %v1206_v54  ;;  %v560_v37 = vpop.xlane.xlu0 %559 }
 0x233   :  { %v1467_v20 = vmul.f32 %v3191_v47, %v1399_v17  ;;  %v3699_v17 = vmul.f32 0.0078125, %v562_v48  ;;  %v3701_v39 = vmul.f32 0.0078125, %v560_v37 }
 0x234   :  { %v2426_v16 = vpop.eup %2425  ;;  %v2099_v38 = vpack.c.bf16 %v1503_v35, %v1502_v42  ;;  %v1466_v2 = vmul.f32 %v3191_v47, %v1398_v59 }
 0x235   :  { %v2428_v44 = vpop.eup %2427  ;;  %v1535_v14 = vadd.f32 %v3204_v1, %v1467_v20  ;;  %v1365_v24 = vmul.f32 %v2426_v16, %v1173_v7  ;;  %v626_v6 = vpop.xlane.xlu1 %625 }
 0x236   :  { %2211 = vst [vmem:[#allocation2 + $0x58] sm:$0xff] %v2099_v38   ;;  %v1534_v4 = vadd.f32 %v3204_v1, %v1466_v2  ;;  %v1364_v31 = vmul.f32 %v2428_v44, %v1172_v23  ;;  %v624_v41 = vpop.xlane.xlu0 %623  ;;  %v1018_v38 = vmul.f32 %v3695_v25, %v3695_v25 }
 0x237   :  { %v1433_v19 = vmul.f32 %v3191_v47, %v1365_v24  ;;  %v985_v24 = vmul.f32 %v3699_v17, %v3699_v17 }
 0x238   :  { %v2430_v57 = vpop.eup %2429  ;;  %v2179_v21 = vpack.c.bf16 %v1535_v14, %v1534_v4  ;;  %v1432_v9 = vmul.f32 %v3191_v47, %v1364_v31  ;;  %v984_v4 = vmul.f32 %v3701_v39, %v3701_v39 }
 0x239   :  { %v2432_v8 = vpop.eup %2431  ;;  %v1501_v3 = vadd.f32 %v3204_v1, %v1433_v19  ;;  %v1397_v18 = vmul.f32 %v2430_v57, %v1205_v26  ;;  %v823_v22 = vpop.xlane.xlu1 %822  ;;  %v3712_v57 = vmul.f32 0.0078125, %v626_v6 }
 0x23a   :  { %2227 = vst [vmem:[#allocation2 + $0xd8] sm:$0xff] %v2179_v21   ;;  %v1500_v15 = vadd.f32 %v3204_v1, %v1432_v9  ;;  %v1396_v51 = vmul.f32 %v2432_v8, %v1204_v55  ;;  %v923_v40 = vmul.f32 0.0078125, %v823_v22  ;;  %v821_v63 = vpop.xlane.xlu0 %820  ;;  %v3714_v8 = vmul.f32 0.0078125, %v624_v41 }
 0x23b   :  { %v1465_v28 = vmul.f32 %v3191_v47, %v1397_v18  ;;  %v922_v30 = vmul.f32 0.0078125, %v821_v63  ;;  %v1017_v63 = vmul.f32 %v3712_v57, %v3712_v57 }
 0x23c   :  { %v2094_v54 = vpack.c.bf16 %v1501_v3, %v1500_v15  ;;  %v1464_v56 = vmul.f32 %v3191_v47, %v1396_v51  ;;  %v1051_v11 = vsub.f32 %v923_v40, %v987_v45 }
 0x23d   :  { %v1533_v35 = vadd.f32 %v3204_v1, %v1465_v28  ;;  %v1050_v42 = vsub.f32 %v922_v30, %v986_v13  ;;  %v887_v59 = vpop.xlane.xlu1 %886  ;;  %v1016_v30 = vmul.f32 %v3714_v8, %v3714_v8 }
 0x23e   :  { %2210 = vst [vmem:[#allocation2 + $0x50] sm:$0xff] %v2094_v54   ;;  %v1532_v7 = vadd.f32 %v3204_v1, %v1464_v56  ;;  %v1115_v20 = vmax.f32 %v1051_v11, 0.0  ;;  %v955_v16 = vmul.f32 0.0078125, %v887_v59  ;;  %v885_v23 = vpop.xlane.xlu0 %884 }
 0x23f   :  { %v1114_v2 = vmax.f32 %v1050_v42, 0.0  ;;  %v954_v44 = vmul.f32 0.0078125, %v885_v23 }
 0x240   :  { %v2174_v48 = vpack.c.bf16 %v1533_v35, %v1532_v7  ;;  %v1243_v14 = vadd.f32 1e-05, %v1115_v20  ;;  %v1083_v37 = vsub.f32 %v955_v16, %v1019_v52  ;;  %v1179_v20 = vsub.f32 %v3248_v43, %v3675_v5 }
 0x241   :  { %v1242_v31 = vadd.f32 1e-05, %v1114_v2  ;;  %v1082_v26 = vsub.f32 %v954_v44, %v1018_v38  ;;  %v819_v19 = vpop.xlane.xlu1 %818  ;;  %v1178_v38 = vsub.f32 %v3261_v10, %v3681_v0  ;;  %v1210_v10 = vsub.f32 %v3286_v29, %v3695_v25 }
 0x242   :  { %2226 = vst [vmem:[#allocation2 + $0xd0] sm:$0xff] %v2174_v48   ;;  %2433 = vrsqrt.f32 %v1243_v14  ;;  %v1147_v55 = vmax.f32 %v1083_v37, 0.0  ;;  %v921_v21 = vmul.f32 0.0078125, %v819_v19  ;;  %v817_v9 = vpop.xlane.xlu0 %816  ;;  %v1176_v29 = vsub.f32 %v3298_v27, %v3701_v39 }
 0x243   :  { %2435 = vrsqrt.f32 %v1242_v31  ;;  %v1146_v3 = vmax.f32 %v1082_v26, 0.0  ;;  %v920_v18 = vmul.f32 0.0078125, %v817_v9  ;;  %v1211_v31 = vsub.f32 %v3265_v49, %v3690_v32 }
 0x244   :  { %v1275_v45 = vadd.f32 1e-05, %v1147_v55  ;;  %v1049_v22 = vsub.f32 %v921_v21, %v985_v24  ;;  %v1177_v49 = vsub.f32 %v3282_v60, %v3699_v17  ;;  %v1209_v17 = vsub.f32 %v3308_v36, %v3712_v57 }
 0x245   :  { %v1274_v15 = vadd.f32 1e-05, %v1146_v3  ;;  %v1048_v51 = vsub.f32 %v920_v18, %v984_v4  ;;  %v883_v40 = vpop.xlane.xlu1 %882 }
 0x246   :  { %2437 = vrsqrt.f32 %v1275_v45  ;;  %v1113_v6 = vmax.f32 %v1049_v22, 0.0  ;;  %v953_v28 = vmul.f32 0.0078125, %v883_v40  ;;  %v881_v13 = vpop.xlane.xlu0 %880 }
 0x247   :  { %2439 = vrsqrt.f32 %v1274_v15  ;;  %v1112_v41 = vmax.f32 %v1048_v51, 0.0  ;;  %v952_v54 = vmul.f32 0.0078125, %v881_v13 }
 0x248   :  { %v1241_v56 = vadd.f32 1e-05, %v1113_v6  ;;  %v1081_v11 = vsub.f32 %v953_v28, %v1017_v63 }
 0x249   :  { %v1240_v35 = vadd.f32 1e-05, %v1112_v41  ;;  %v1080_v42 = vsub.f32 %v952_v54, %v1016_v30  ;;  %v574_v59 = vpop.xlane.xlu1 %573  ;;  %v1208_v41 = vsub.f32 %v3315_v61, %v3714_v8 }
 0x24a   :  { %2441 = vrsqrt.f32 %v1241_v56  ;;  %v1145_v7 = vmax.f32 %v1081_v11, 0.0  ;;  %v572_v52 = vpop.xlane.xlu0 %571  ;;  %v3744_v13 = vmul.f32 0.0078125, %v574_v59 }
 0x24b   :  { %2443 = vrsqrt.f32 %v1240_v35  ;;  %v1144_v16 = vmax.f32 %v1080_v42, 0.0  ;;  %v3749_v39 = vmul.f32 0.0078125, %v572_v52 }
 0x24c   :  { %v2434_v23 = vpop.eup %2433  ;;  %v1273_v2 = vadd.f32 1e-05, %v1145_v7  ;;  %v991_v52 = vmul.f32 %v3744_v13, %v3744_v13 }
 0x24d   :  { %v2436_v44 = vpop.eup %2435  ;;  %v1371_v48 = vmul.f32 %v2434_v23, %v1179_v20  ;;  %v1272_v14 = vadd.f32 1e-05, %v1144_v16  ;;  %v3724_v37 = vpop.xlane.xlu1 %637  ;;  %v990_v8 = vmul.f32 %v3749_v39, %v3749_v39 }
 0x24e   :  { %v1370_v24 = vmul.f32 %v2436_v44, %v1178_v38  ;;  %2445 = vrsqrt.f32 %v1273_v2  ;;  %v3726_v4 = vpop.xlane.xlu0 %635 }
 0x24f   :  { %v1439_v43 = vmul.f32 %v3191_v47, %v1371_v48  ;;  %2447 = vrsqrt.f32 %v1272_v14 }
 0x250   :  { %v2438_v5 = vpop.eup %2437  ;;  %v1438_v0 = vmul.f32 %v3191_v47, %v1370_v24 }
 0x251   :  { %v2440_v26 = vpop.eup %2439  ;;  %v1507_v19 = vadd.f32 %v3204_v1, %v1439_v43  ;;  %v1403_v55 = vmul.f32 %v2438_v5, %v1211_v31  ;;  %v570_v21 = vpop.xlane.xlu1 %569 }
 0x252   :  { %v1506_v9 = vadd.f32 %v3204_v1, %v1438_v0  ;;  %v1402_v3 = vmul.f32 %v2440_v26, %v1210_v10  ;;  %v568_v18 = vpop.xlane.xlu0 %567  ;;  %v3755_v59 = vmul.f32 0.0078125, %v570_v21 }
 0x253   :  { %v1471_v32 = vmul.f32 %v3191_v47, %v1403_v55  ;;  %v3763_v23 = vmul.f32 0.0078125, %v568_v18 }
 0x254   :  { %v2442_v45 = vpop.eup %2441  ;;  %v2109_v25 = vpack.c.bf16 %v1507_v19, %v1506_v9  ;;  %v1470_v22 = vmul.f32 %v3191_v47, %v1402_v3  ;;  %v989_v24 = vmul.f32 %v3755_v59, %v3755_v59 }
 0x255   :  { %v2444_v15 = vpop.eup %2443  ;;  %v1539_v51 = vadd.f32 %v3204_v1, %v1471_v32  ;;  %v1369_v40 = vmul.f32 %v2442_v45, %v1177_v49  ;;  %v634_v63 = vpop.xlane.xlu1 %633  ;;  %v988_v55 = vmul.f32 %v3763_v23, %v3763_v23  ;;  %v3777_v45 = vmul.f32 0.0078125, %v3724_v37 }
 0x256   :  { %2213 = vst [vmem:[#allocation2 + $0x68] sm:$0xff] %v2109_v25   ;;  %v1538_v6 = vadd.f32 %v3204_v1, %v1470_v22  ;;  %v1368_v28 = vmul.f32 %v2444_v15, %v1176_v29  ;;  %v632_v60 = vpop.xlane.xlu0 %631  ;;  %v3770_v10 = vmul.f32 0.0078125, %v634_v63  ;;  %v3780_v29 = vmul.f32 0.0078125, %v3726_v4 }
 0x257   :  { %v1437_v27 = vmul.f32 %v3191_v47, %v1369_v40  ;;  %v3774_v21 = vmul.f32 0.0078125, %v632_v60 }
 0x258   :  { %v2446_v30 = vpop.eup %2445  ;;  %v2189_v54 = vpack.c.bf16 %v1539_v51, %v1538_v6  ;;  %v1436_v56 = vmul.f32 %v3191_v47, %v1368_v28  ;;  %v1021_v51 = vmul.f32 %v3770_v10, %v3770_v10 }
 0x259   :  { %v2448_v11 = vpop.eup %2447  ;;  %v1505_v35 = vadd.f32 %v3204_v1, %v1437_v27  ;;  %v1401_v42 = vmul.f32 %v2446_v30, %v1209_v17  ;;  %v831_v7 = vpop.xlane.xlu1 %830  ;;  %v1020_v28 = vmul.f32 %v3774_v21, %v3774_v21 }
 0x25a   :  { %2229 = vst [vmem:[#allocation2 + $0xe8] sm:$0xff] %v2189_v54   ;;  %v1504_v36 = vadd.f32 %v3204_v1, %v1436_v56  ;;  %v1400_v57 = vmul.f32 %v2448_v11, %v1208_v41  ;;  %v927_v20 = vmul.f32 0.0078125, %v831_v7  ;;  %v829_v16 = vpop.xlane.xlu0 %828  ;;  %v1023_v54 = vmul.f32 %v3777_v45, %v3777_v45 }
 0x25b   :  { %v1469_v61 = vmul.f32 %v3191_v47, %v1401_v42  ;;  %v926_v38 = vmul.f32 0.0078125, %v829_v16  ;;  %v1022_v42 = vmul.f32 %v3780_v29, %v3780_v29 }
 0x25c   :  { %v2104_v2 = vpack.c.bf16 %v1505_v35, %v1504_v36  ;;  %v1468_v44 = vmul.f32 %v3191_v47, %v1400_v57  ;;  %v1055_v48 = vsub.f32 %v927_v20, %v991_v52 }
 0x25d   :  { %v1537_v14 = vadd.f32 %v3204_v1, %v1469_v61  ;;  %v1054_v31 = vsub.f32 %v926_v38, %v990_v8  ;;  %v827_v43 = vpop.xlane.xlu1 %826  ;;  %v1183_v8 = vsub.f32 %v3366_v34, %v3744_v13  ;;  %v1180_v34 = vsub.f32 %v3424_v53, %v3763_v23 }
 0x25e   :  { %2212 = vst [vmem:[#allocation2 + $0x60] sm:$0xff] %v2104_v2   ;;  %v1536_v5 = vadd.f32 %v3204_v1, %v1468_v44  ;;  %v1119_v0 = vmax.f32 %v1055_v48, 0.0  ;;  %v925_v26 = vmul.f32 0.0078125, %v827_v43  ;;  %v825_v19 = vpop.xlane.xlu0 %824  ;;  %v1182_v44 = vsub.f32 %v3387_v50, %v3749_v39 }
 0x25f   :  { %v1118_v9 = vmax.f32 %v1054_v31, 0.0  ;;  %v924_v3 = vmul.f32 0.0078125, %v825_v19 }
 0x260   :  { %v2184_v18 = vpack.c.bf16 %v1537_v14, %v1536_v5  ;;  %v1247_v49 = vadd.f32 1e-05, %v1119_v0  ;;  %v1053_v32 = vsub.f32 %v925_v26, %v989_v24  ;;  %v1181_v5 = vsub.f32 %v3408_v12, %v3755_v59 }
 0x261   :  { %v1246_v25 = vadd.f32 1e-05, %v1118_v9  ;;  %v1052_v22 = vsub.f32 %v924_v3, %v988_v55  ;;  %v891_v15 = vpop.xlane.xlu1 %890  ;;  %v1213_v3 = vsub.f32 %v3434_v46, %v3770_v10  ;;  %v1215_v46 = vsub.f32 %v3391_v58, %v3777_v45 }
 0x262   :  { %2228 = vst [vmem:[#allocation2 + $0xe0] sm:$0xff] %v2184_v18   ;;  %2449 = vrsqrt.f32 %v1247_v49  ;;  %v1117_v40 = vmax.f32 %v1053_v32, 0.0  ;;  %v957_v63 = vmul.f32 0.0078125, %v891_v15  ;;  %v889_v6 = vpop.xlane.xlu0 %888  ;;  %v1212_v18 = vsub.f32 %v3441_v62, %v3774_v21 }
 0x263   :  { %2451 = vrsqrt.f32 %v1246_v25  ;;  %v1116_v37 = vmax.f32 %v1052_v22, 0.0  ;;  %v956_v60 = vmul.f32 0.0078125, %v889_v6  ;;  %v1214_v62 = vsub.f32 %v3412_v33, %v3780_v29 }
 0x264   :  { %v1245_v17 = vadd.f32 1e-05, %v1117_v40  ;;  %v1085_v4 = vsub.f32 %v957_v63, %v1021_v51 }
 0x265   :  { %v1244_v27 = vadd.f32 1e-05, %v1116_v37  ;;  %v1084_v30 = vsub.f32 %v956_v60, %v1020_v28  ;;  %v895_v41 = vpop.xlane.xlu1 %894 }
 0x266   :  { %2453 = vrsqrt.f32 %v1245_v17  ;;  %v1149_v56 = vmax.f32 %v1085_v4, 0.0  ;;  %v959_v11 = vmul.f32 0.0078125, %v895_v41  ;;  %v893_v35 = vpop.xlane.xlu0 %892 }
 0x267   :  { %2455 = vrsqrt.f32 %v1244_v27  ;;  %v1148_v7 = vmax.f32 %v1084_v30, 0.0  ;;  %v958_v36 = vmul.f32 0.0078125, %v893_v35 }
 0x268   :  { %v1277_v57 = vadd.f32 1e-05, %v1149_v56  ;;  %v1087_v52 = vsub.f32 %v959_v11, %v1023_v54 }
 0x269   :  { %v1276_v20 = vadd.f32 1e-05, %v1148_v7  ;;  %v1086_v16 = vsub.f32 %v958_v36, %v1022_v42 }
 0x26a   :  { %2457 = vrsqrt.f32 %v1277_v57  ;;  %v1151_v61 = vmax.f32 %v1087_v52, 0.0 }
 0x26b   :  { %2459 = vrsqrt.f32 %v1276_v20  ;;  %v1150_v38 = vmax.f32 %v1086_v16, 0.0 }
 0x26c   :  { %v2450_v2 = vpop.eup %2449  ;;  %v1279_v48 = vadd.f32 1e-05, %v1151_v61 }
 0x26d   :  { %v2452_v14 = vpop.eup %2451  ;;  %v1375_v24 = vmul.f32 %v2450_v2, %v1183_v8  ;;  %v1278_v31 = vadd.f32 1e-05, %v1150_v38 }
 0x26e   :  { %v1374_v43 = vmul.f32 %v2452_v14, %v1182_v44  ;;  %2461 = vrsqrt.f32 %v1279_v48 }
 0x26f   :  { %v1443_v0 = vmul.f32 %v3191_v47, %v1375_v24  ;;  %2463 = vrsqrt.f32 %v1278_v31 }
 0x270   :  { %v2454_v26 = vpop.eup %2453  ;;  %v1442_v13 = vmul.f32 %v3191_v47, %v1374_v43 }
 0x271   :  { %v2456_v19 = vpop.eup %2455  ;;  %v1511_v50 = vadd.f32 %v3204_v1, %v1443_v0  ;;  %v1373_v39 = vmul.f32 %v2454_v26, %v1181_v5 }
 0x272   :  { %v1510_v55 = vadd.f32 %v3204_v1, %v1442_v13  ;;  %v1372_v9 = vmul.f32 %v2456_v19, %v1180_v34 }
 0x273   :  { %v1441_v12 = vmul.f32 %v3191_v47, %v1373_v39 }
 0x274   :  { %v2458_v59 = vpop.eup %2457  ;;  %v2119_v49 = vpack.c.bf16 %v1511_v50, %v1510_v55  ;;  %v1440_v53 = vmul.f32 %v3191_v47, %v1372_v9 }
 0x275   :  { %v2460_v23 = vpop.eup %2459  ;;  %v1509_v32 = vadd.f32 %v3204_v1, %v1441_v12  ;;  %v1405_v25 = vmul.f32 %v2458_v59, %v1213_v3 }
 0x276   :  { %2215 = vst [vmem:[#allocation2 + $0x78] sm:$0xff] %v2119_v49   ;;  %v1508_v22 = vadd.f32 %v3204_v1, %v1440_v53  ;;  %v1404_v15 = vmul.f32 %v2460_v23, %v1212_v18 }
 0x277   :  { %v1473_v10 = vmul.f32 %v3191_v47, %v1405_v25 }
 0x278   :  { %v2462_v51 = vpop.eup %2461  ;;  %v2114_v21 = vpack.c.bf16 %v1509_v32, %v1508_v22  ;;  %v1472_v40 = vmul.f32 %v3191_v47, %v1404_v15 }
 0x279   :  { %v2464_v63 = vpop.eup %2463  ;;  %v1541_v6 = vadd.f32 %v3204_v1, %v1473_v10  ;;  %v1407_v28 = vmul.f32 %v2462_v51, %v1215_v46 }
 0x27a   :  { %2214 = vst [vmem:[#allocation2 + $0x70] sm:$0xff] %v2114_v21   ;;  %v1540_v37 = vadd.f32 %v3204_v1, %v1472_v40  ;;  %v1406_v60 = vmul.f32 %v2464_v63, %v1214_v62 }
 0x27b   :  { %v1475_v17 = vmul.f32 %v3191_v47, %v1407_v28 }
 0x27c   :  { %v2194_v58 = vpack.c.bf16 %v1541_v6, %v1540_v37  ;;  %v1474_v45 = vmul.f32 %v3191_v47, %v1406_v60 }
 0x27d   :  { %v1543_v33 = vadd.f32 %v3204_v1, %v1475_v17 }
 0x27e   :  { %2230 = vst [vmem:[#allocation2 + $0xf0] sm:$0xff] %v2194_v58   ;;  %v1542_v29 = vadd.f32 %v3204_v1, %v1474_v45 }
 0x280   :  { %v2199_v4 = vpack.c.bf16 %v1543_v33, %v1542_v29 }
 0x282   :  { %2231 = vst [vmem:[#allocation2 + $0xf8] sm:$0xff] %v2199_v4  }
 0x283   :  { %2476 = shalt.err (!%p2473_p4)
}
 0x284   :  { %s2477_s7 = scalar_lea.hbm %s3837_s3, 4096 }
 0x285   :  { %p2478_p5 = scmp.ne.s32.totalorder %s3837_s3, %s2477_s7  ;;  %p2481_p6 = scmp.lt.u32.totalorder %s2477_s7, %s3837_s3 }
 0x287   :  { %p2483_p7 = pnand %p2481_p6, %p2478_p5 }
 0x289   :  { %2486 = shalt.err (!%p2483_p7)
}
 0x28a   :  { %s2490_s12 = smov 64   ;;  %s2491_s13 = smov 4  }
 0x28b   :  { %1875 = dma.vmem_to_hbm [thread:$0]  %s1870_s2, 4096, %s3837_s3, [#allocation3], %s2490_s12, %s2490_s12, %s2491_s13  }
 0x28c   :  { %2487 = dma.done.wait [#allocation3], 4096  }
 0x28d   :  { %2488 = vsyncadd [#allocation3], 4294963200 }
 0x28e   :  { %1879 = vsyncpa [#allocation3], 1 }

</bundles_post_ra>
